<compile_context>
chip_gen: v6e
topology: v6e:2x2x1
jax: 0.10.0
libtpu: 0.0.40
codegen_flags: <defaults>
</compile_context>

<pallas_src>
import math
import functools

import jax
import jax.numpy as jnp
from jax.experimental import pallas as pl
from jax.experimental.pallas import tpu as pltpu


def _attention_core(qp, kp, vp, wo, bo, o_ref, *, B, S, H, num_heads, head_size):
    """qp/kp/vp: (B*S, H) float32 projected activations. Writes o_ref (B, S, H)."""
    scale = 1.0 / math.sqrt(head_size)

    # Keep H on the lane axis; split heads by static lane slices (no transpose).
    q3 = (qp * scale).reshape(B, S, H).astype(jnp.bfloat16)
    k3 = kp.reshape(B, S, H).astype(jnp.bfloat16)
    v3 = vp.reshape(B, S, H).astype(jnp.bfloat16)

    head_ctx = []
    for h in range(num_heads):          # small static loop (num_heads = 4)
        lo = h * head_size
        hi = lo + head_size
        qh = q3[:, :, lo:hi]            # (B, S, hd) lane-dense slice
        kh = k3[:, :, lo:hi]
        vh = v3[:, :, lo:hi]

        # scores = Q K^T / sqrt(d)  (bf16 operands, f32 accumulate)
        s = jnp.einsum('bqd,bkd->bqk', qh, kh,
                       preferred_element_type=jnp.float32)      # (B, S, S)
        # numerically-stable softmax, kept in f32
        s = s - jnp.max(s, axis=-1, keepdims=True)
        p = jnp.exp(s)
        p = p * pl.reciprocal(jnp.sum(p, axis=-1, keepdims=True), approx=True)
        # dropout(p) -> identity in eval mode.

        head_ctx.append(
            jnp.einsum('bqk,bkd->bqd', p.astype(jnp.bfloat16), vh,
                       preferred_element_type=jnp.float32))      # (B, S, hd)

    attn = jnp.concatenate(head_ctx, axis=-1).reshape(B * S, H)  # (B*S, H) f32

    out = jnp.dot(attn.astype(jnp.bfloat16), wo,
                  preferred_element_type=jnp.float32) + bo
    o_ref[...] = out.reshape(B, S, H).astype(o_ref.dtype)


def _mha_self_kernel(x_ref, wqkv_ref, bqkv_ref, wo_ref, bo_ref, o_ref,
                     *, num_heads, head_size):
    """Self-attention fast path: one fused (B*S, H) @ (H, 3H) projection matmul."""
    B, S, H = x_ref.shape
    x = x_ref[...].reshape(B * S, H).astype(jnp.bfloat16)

    # Single fused QKV projection + single fused bias add.
    qkv = jnp.dot(x, wqkv_ref[...],
                  preferred_element_type=jnp.float32) + bqkv_ref[...]  # (B*S, 3H)

    _attention_core(qkv[:, :H], qkv[:, H:2 * H], qkv[:, 2 * H:],
                    wo_ref[...], bo_ref[...], o_ref,
                    B=B, S=S, H=H, num_heads=num_heads, head_size=head_size)


def _mha_general_kernel(q_ref, k_ref, v_ref, wqkv_ref, bqkv_ref, wo_ref, bo_ref,
                        o_ref, *, num_heads, head_size):
    """General path (distinct query / key / value inputs). Shares the fused
    (H, 3H) weight (single weight DMA); three matmuls since the LHS differs."""
    B, S, H = q_ref.shape
    w = wqkv_ref[...]
    b = bqkv_ref[...]

    q = q_ref[...].reshape(B * S, H).astype(jnp.bfloat16)
    k = k_ref[...].reshape(B * S, H).astype(jnp.bfloat16)
    v = v_ref[...].reshape(B * S, H).astype(jnp.bfloat16)

    qp = jnp.dot(q, w[:, :H], preferred_element_type=jnp.float32) + b[:, :H]
    kp = jnp.dot(k, w[:, H:2 * H], preferred_element_type=jnp.float32) + b[:, H:2 * H]
    vp = jnp.dot(v, w[:, 2 * H:], preferred_element_type=jnp.float32) + b[:, 2 * H:]

    _attention_core(qp, kp, vp, wo_ref[...], bo_ref[...], o_ref,
                    B=B, S=S, H=H, num_heads=num_heads, head_size=head_size)


def multi_head_attention(query, key, value, params, *, num_heads):
    """query/key/value: (B, S, H) float32. params: wq/bq/wk/bk/wv/bv/wo/bo."""
    B, S, H = query.shape
    head_size = H // num_heads

    # Fused QKV weight/bias (one weight DMA into the kernel). Weights are fed
    # to the MXU as bf16 (f32 accumulation); biases stay f32.
    wqkv = jnp.concatenate([params["wq"], params["wk"], params["wv"]],
                           axis=1).astype(jnp.bfloat16)          # (H, 3H)
    bqkv = jnp.concatenate([params["bq"], params["bk"], params["bv"]],
                           axis=1)                               # (1, 3H) f32
    wo = params["wo"].astype(jnp.bfloat16)                       # (H, H)
    bo = params["bo"]                                            # (1, H) f32

    # Whole (small) problem in one grid step: fold batch into the block.
    act_spec = pl.BlockSpec((B, S, H), lambda i: (0, 0, 0))
    wqkv_spec = pl.BlockSpec((H, 3 * H), lambda i: (0, 0))
    bqkv_spec = pl.BlockSpec((1, 3 * H), lambda i: (0, 0))
    wo_spec = pl.BlockSpec((H, H), lambda i: (0, 0))
    bo_spec = pl.BlockSpec((1, H), lambda i: (0, 0))

    compiler_params = pltpu.CompilerParams(dimension_semantics=("arbitrary",))
    out_shape = jax.ShapeDtypeStruct((B, S, H), query.dtype)

    if query is key and key is value:
        # Self-attention (how the Transformer spec calls this module for x,x,x):
        # single fused QKV matmul.
        kernel = functools.partial(_mha_self_kernel,
                                   num_heads=num_heads, head_size=head_size)
        return pl.pallas_call(
            kernel,
            out_shape=out_shape,
            grid_spec=pltpu.PrefetchScalarGridSpec(
                num_scalar_prefetch=0,
                grid=(1,),
                in_specs=[act_spec, wqkv_spec, bqkv_spec, wo_spec, bo_spec],
                out_specs=act_spec),
            compiler_params=compiler_params,
        )(query, wqkv, bqkv, wo, bo)

    kernel = functools.partial(_mha_general_kernel,
                               num_heads=num_heads, head_size=head_size)
    return pl.pallas_call(
        kernel,
        out_shape=out_shape,
        grid_spec=pltpu.PrefetchScalarGridSpec(
            num_scalar_prefetch=0,
            grid=(1,),
            in_specs=[act_spec, act_spec, act_spec,
                      wqkv_spec, bqkv_spec, wo_spec, bo_spec],
            out_specs=act_spec),
        compiler_params=compiler_params,
    )(query, key, value, wqkv, bqkv, wo, bo)


def _init_linear(key, in_features, out_features):
    # PyTorch nn.Linear default init: U(-1/sqrt(in), 1/sqrt(in)).
    kw, kb = jax.random.split(key)
    bound = 1.0 / math.sqrt(in_features)
    # Stored already transposed: (in, out) so x @ W matches x @ W_torch.T
    w = jax.random.uniform(kw, (in_features, out_features),
                           minval=-bound, maxval=bound, dtype=jnp.float32)
    b = jax.random.uniform(kb, (1, out_features),
                           minval=-bound, maxval=bound, dtype=jnp.float32)
    return w, b


def _reference_mha(q, k, v, params, num_heads):
    B, S, H = q.shape
    hd = H // num_heads

    def proj(x, w, b):
        return x @ w + b

    qp = proj(q, params["wq"], params["bq"]).reshape(B, S, num_heads, hd).transpose(0, 2, 1, 3)
    kp = proj(k, params["wk"], params["bk"]).reshape(B, S, num_heads, hd).transpose(0, 2, 1, 3)
    vp = proj(v, params["wv"], params["bv"]).reshape(B, S, num_heads, hd).transpose(0, 2, 1, 3)
    scores = jnp.einsum('bhqd,bhkd->bhqk', qp, kp) / math.sqrt(hd)
    p = jax.nn.softmax(scores, axis=-1)
    attn = jnp.einsum('bhqk,bhkd->bhqd', p, vp)
    attn = attn.transpose(0, 2, 1, 3).reshape(B, S, H)
    return attn @ params["wo"] + params["bo"]


if __name__ == "__main__":
    # Shapes consistent with the module spec: hidden_size=256, num_heads=4.
    B, S, H = 2, 8, 256
    NUM_HEADS = 4

    root = jax.random.PRNGKey(0)
    kx, kq, kk, kv, kwq, kwk, kwv, kwo = jax.random.split(root, 8)

    wq, bq = _init_linear(kwq, H, H)
    wk, bk = _init_linear(kwk, H, H)
    wv, bv = _init_linear(kwv, H, H)
    wo, bo = _init_linear(kwo, H, H)
    params = dict(wq=wq, bq=bq, wk=wk, bk=bk, wv=wv, bv=bv, wo=wo, bo=bo)

    # bf16 MXU operands (f32 accumulation) -> compare against f32 reference
    # with a relaxed tolerance, as anticipated in the review.
    TOL = 2e-2

    # 1) Self-attention path (q is k is v): fused single QKV matmul.
    x = jax.random.normal(kx, (B, S, H), dtype=jnp.float32)
    out_self = multi_head_attention(x, x, x, params, num_heads=NUM_HEADS)
    out_self = jax.block_until_ready(out_self)
    ref_self = _reference_mha(x, x, x, params, NUM_HEADS)
    assert out_self.shape == (B, S, H)
    assert jnp.allclose(out_self, ref_self, atol=TOL, rtol=TOL), \
        "self-attention mismatch vs reference"

    # 2) General path (distinct query / key / value).
    query = jax.random.normal(kq, (B, S, H), dtype=jnp.float32)
    key = jax.random.normal(kk, (B, S, H), dtype=jnp.float32)
    value = jax.random.normal(kv, (B, S, H), dtype=jnp.float32)
    out = multi_head_attention(query, key, value, params, num_heads=NUM_HEADS)
    out = jax.block_until_ready(out)
    ref = _reference_mha(query, key, value, params, NUM_HEADS)
    assert out.shape == (B, S, H)
    assert jnp.allclose(out, ref, atol=TOL, rtol=TOL), \
        "general attention mismatch vs reference"

    print("KERNEL_OK")
</pallas_src>

<mosaic_0001>
module attributes {stable_mosaic.version = 11 : i64} {
  func.func @_mha_self_kernel(%arg0: i32, %arg1: memref<2x8x256xf32, #tpu.memory_space<vmem>>, %arg2: memref<256x768xbf16, #tpu.memory_space<vmem>>, %arg3: memref<1x768xf32, #tpu.memory_space<vmem>>, %arg4: memref<256x256xbf16, #tpu.memory_space<vmem>>, %arg5: memref<1x256xf32, #tpu.memory_space<vmem>>, %arg6: memref<2x8x256xf32, #tpu.memory_space<vmem>>) attributes {dimension_semantics = [#tpu.dimension_semantics<arbitrary>], iteration_bounds = array<i64: 1>, scalar_prefetch = 0 : i64, scratch_operands = 0 : i64, tpu.core_type = #tpu.core_type<tc>, window_params = [{pipeline_mode = #tpu.pipeline_mode<synchronous>, transform_indices = @transform_0, window_bounds = array<i64: 2, 8, 256>}, {pipeline_mode = #tpu.pipeline_mode<synchronous>, transform_indices = @transform_1, window_bounds = array<i64: 256, 768>}, {pipeline_mode = #tpu.pipeline_mode<synchronous>, transform_indices = @transform_2, window_bounds = array<i64: 1, 768>}, {pipeline_mode = #tpu.pipeline_mode<synchronous>, transform_indices = @transform_3, window_bounds = array<i64: 256, 256>}, {pipeline_mode = #tpu.pipeline_mode<synchronous>, transform_indices = @transform_4, window_bounds = array<i64: 1, 256>}, {pipeline_mode = #tpu.pipeline_mode<synchronous>, transform_indices = @transform_5, window_bounds = array<i64: 2, 8, 256>}]} {
    %c0 = arith.constant 0 : index
    %c0_0 = arith.constant 0 : index
    %c0_1 = arith.constant 0 : index
    %0 = vector.load %arg1[%c0, %c0_0, %c0_1] : memref<2x8x256xf32, #tpu.memory_space<vmem>>, vector<2x8x256xf32>
    %1 = vector.shape_cast %0 : vector<2x8x256xf32> to vector<16x256xf32>
    %2 = arith.truncf %1 : vector<16x256xf32> to vector<16x256xbf16>
    %c0_2 = arith.constant 0 : index
    %c0_3 = arith.constant 0 : index
    %3 = vector.load %arg2[%c0_2, %c0_3] : memref<256x768xbf16, #tpu.memory_space<vmem>>, vector<256x768xbf16>
    %cst = arith.constant dense<0.000000e+00> : vector<16x768xf32>
    %4 = tpu.matmul %2, %3, %cst {dimension_numbers = #tpu.dot_dimension_numbers<[1], [0], [0], [1], [0, 0, 1, 1], [], []>} : vector<16x256xbf16>, vector<256x768xbf16>, vector<16x768xf32> -> vector<16x768xf32>
    %c0_4 = arith.constant 0 : index
    %c0_5 = arith.constant 0 : index
    %5 = vector.load %arg3[%c0_4, %c0_5] : memref<1x768xf32, #tpu.memory_space<vmem>>, vector<1x768xf32>
    %6 = vector.broadcast %5 : vector<1x768xf32> to vector<16x768xf32>
    %7 = arith.addf %4, %6 : vector<16x768xf32>
    %8 = vector.extract_strided_slice %7 {offsets = [0, 0], sizes = [16, 256], strides = [1, 1]} : vector<16x768xf32> to vector<16x256xf32>
    %9 = vector.extract_strided_slice %7 {offsets = [0, 256], sizes = [16, 256], strides = [1, 1]} : vector<16x768xf32> to vector<16x256xf32>
    %10 = vector.extract_strided_slice %7 {offsets = [0, 512], sizes = [16, 256], strides = [1, 1]} : vector<16x768xf32> to vector<16x256xf32>
    %c0_6 = arith.constant 0 : index
    %c0_7 = arith.constant 0 : index
    %11 = vector.load %arg4[%c0_6, %c0_7] : memref<256x256xbf16, #tpu.memory_space<vmem>>, vector<256x256xbf16>
    %c0_8 = arith.constant 0 : index
    %c0_9 = arith.constant 0 : index
    %12 = vector.load %arg5[%c0_8, %c0_9] : memref<1x256xf32, #tpu.memory_space<vmem>>, vector<1x256xf32>
    %cst_10 = arith.constant 1.250000e-01 : f32
    %13 = vector.broadcast %cst_10 : f32 to vector<16x256xf32>
    %14 = arith.mulf %8, %13 : vector<16x256xf32>
    %15 = vector.shape_cast %14 : vector<16x256xf32> to vector<2x8x256xf32>
    %16 = arith.truncf %15 : vector<2x8x256xf32> to vector<2x8x256xbf16>
    %17 = vector.shape_cast %9 : vector<16x256xf32> to vector<2x8x256xf32>
    %18 = arith.truncf %17 : vector<2x8x256xf32> to vector<2x8x256xbf16>
    %19 = vector.shape_cast %10 : vector<16x256xf32> to vector<2x8x256xf32>
    %20 = arith.truncf %19 : vector<2x8x256xf32> to vector<2x8x256xbf16>
    %21 = vector.extract_strided_slice %16 {offsets = [0, 0, 0], sizes = [2, 8, 64], strides = [1, 1, 1]} : vector<2x8x256xbf16> to vector<2x8x64xbf16>
    %22 = vector.extract_strided_slice %18 {offsets = [0, 0, 0], sizes = [2, 8, 64], strides = [1, 1, 1]} : vector<2x8x256xbf16> to vector<2x8x64xbf16>
    %23 = vector.extract_strided_slice %20 {offsets = [0, 0, 0], sizes = [2, 8, 64], strides = [1, 1, 1]} : vector<2x8x256xbf16> to vector<2x8x64xbf16>
    "tpu.trace_start"() <{level = 10 : i32, message = "bqd,bkd->bqk"}> : () -> ()
    %cst_11 = arith.constant dense<0.000000e+00> : vector<2x8x8xf32>
    %24 = tpu.matmul %21, %22, %cst_11 {dimension_numbers = #tpu.dot_dimension_numbers<[2], [2], [1], [1], [0, 0, 0, 1, 1, 1], [0], [0]>} : vector<2x8x64xbf16>, vector<2x8x64xbf16>, vector<2x8x8xf32> -> vector<2x8x8xf32>
    "tpu.trace_stop"() : () -> ()
    %cst_12 = arith.constant dense<0xFF800000> : vector<2x8xf32>
    %25 = vector.multi_reduction <maximumf>, %24, %cst_12 [2] : vector<2x8x8xf32> to vector<2x8xf32>
    %26 = vector.shape_cast %25 : vector<2x8xf32> to vector<2x8x1xf32>
    %27 = vector.broadcast %26 : vector<2x8x1xf32> to vector<2x8x8xf32>
    %28 = arith.subf %24, %27 : vector<2x8x8xf32>
    %29 = math.exp %28 : vector<2x8x8xf32>
    %cst_13 = arith.constant dense<0.000000e+00> : vector<2x8xf32>
    %30 = vector.multi_reduction <add>, %29, %cst_13 [2] : vector<2x8x8xf32> to vector<2x8xf32>
    %31 = vector.shape_cast %30 : vector<2x8xf32> to vector<2x8x1xf32>
    %32 = tpu.reciprocal %31 {approx = true} : vector<2x8x1xf32> -> vector<2x8x1xf32>
    %33 = vector.broadcast %32 : vector<2x8x1xf32> to vector<2x8x8xf32>
    %34 = arith.mulf %29, %33 : vector<2x8x8xf32>
    %35 = arith.truncf %34 : vector<2x8x8xf32> to vector<2x8x8xbf16>
    "tpu.trace_start"() <{level = 10 : i32, message = "bqk,bkd->bqd"}> : () -> ()
    %cst_14 = arith.constant dense<0.000000e+00> : vector<2x8x64xf32>
    %36 = tpu.matmul %35, %23, %cst_14 {dimension_numbers = #tpu.dot_dimension_numbers<[2], [1], [1], [2], [0, 0, 0, 1, 1, 2], [0], [0]>} : vector<2x8x8xbf16>, vector<2x8x64xbf16>, vector<2x8x64xf32> -> vector<2x8x64xf32>
    "tpu.trace_stop"() : () -> ()
    %37 = vector.extract_strided_slice %16 {offsets = [0, 0, 64], sizes = [2, 8, 64], strides = [1, 1, 1]} : vector<2x8x256xbf16> to vector<2x8x64xbf16>
    %38 = vector.extract_strided_slice %18 {offsets = [0, 0, 64], sizes = [2, 8, 64], strides = [1, 1, 1]} : vector<2x8x256xbf16> to vector<2x8x64xbf16>
    %39 = vector.extract_strided_slice %20 {offsets = [0, 0, 64], sizes = [2, 8, 64], strides = [1, 1, 1]} : vector<2x8x256xbf16> to vector<2x8x64xbf16>
    "tpu.trace_start"() <{level = 10 : i32, message = "bqd,bkd->bqk"}> : () -> ()
    %cst_15 = arith.constant dense<0.000000e+00> : vector<2x8x8xf32>
    %40 = tpu.matmul %37, %38, %cst_15 {dimension_numbers = #tpu.dot_dimension_numbers<[2], [2], [1], [1], [0, 0, 0, 1, 1, 1], [0], [0]>} : vector<2x8x64xbf16>, vector<2x8x64xbf16>, vector<2x8x8xf32> -> vector<2x8x8xf32>
    "tpu.trace_stop"() : () -> ()
    %cst_16 = arith.constant dense<0xFF800000> : vector<2x8xf32>
    %41 = vector.multi_reduction <maximumf>, %40, %cst_16 [2] : vector<2x8x8xf32> to vector<2x8xf32>
    %42 = vector.shape_cast %41 : vector<2x8xf32> to vector<2x8x1xf32>
    %43 = vector.broadcast %42 : vector<2x8x1xf32> to vector<2x8x8xf32>
    %44 = arith.subf %40, %43 : vector<2x8x8xf32>
    %45 = math.exp %44 : vector<2x8x8xf32>
    %cst_17 = arith.constant dense<0.000000e+00> : vector<2x8xf32>
    %46 = vector.multi_reduction <add>, %45, %cst_17 [2] : vector<2x8x8xf32> to vector<2x8xf32>
    %47 = vector.shape_cast %46 : vector<2x8xf32> to vector<2x8x1xf32>
    %48 = tpu.reciprocal %47 {approx = true} : vector<2x8x1xf32> -> vector<2x8x1xf32>
    %49 = vector.broadcast %48 : vector<2x8x1xf32> to vector<2x8x8xf32>
    %50 = arith.mulf %45, %49 : vector<2x8x8xf32>
    %51 = arith.truncf %50 : vector<2x8x8xf32> to vector<2x8x8xbf16>
    "tpu.trace_start"() <{level = 10 : i32, message = "bqk,bkd->bqd"}> : () -> ()
    %cst_18 = arith.constant dense<0.000000e+00> : vector<2x8x64xf32>
    %52 = tpu.matmul %51, %39, %cst_18 {dimension_numbers = #tpu.dot_dimension_numbers<[2], [1], [1], [2], [0, 0, 0, 1, 1, 2], [0], [0]>} : vector<2x8x8xbf16>, vector<2x8x64xbf16>, vector<2x8x64xf32> -> vector<2x8x64xf32>
    "tpu.trace_stop"() : () -> ()
    %53 = vector.extract_strided_slice %16 {offsets = [0, 0, 128], sizes = [2, 8, 64], strides = [1, 1, 1]} : vector<2x8x256xbf16> to vector<2x8x64xbf16>
    %54 = vector.extract_strided_slice %18 {offsets = [0, 0, 128], sizes = [2, 8, 64], strides = [1, 1, 1]} : vector<2x8x256xbf16> to vector<2x8x64xbf16>
    %55 = vector.extract_strided_slice %20 {offsets = [0, 0, 128], sizes = [2, 8, 64], strides = [1, 1, 1]} : vector<2x8x256xbf16> to vector<2x8x64xbf16>
    "tpu.trace_start"() <{level = 10 : i32, message = "bqd,bkd->bqk"}> : () -> ()
    %cst_19 = arith.constant dense<0.000000e+00> : vector<2x8x8xf32>
    %56 = tpu.matmul %53, %54, %cst_19 {dimension_numbers = #tpu.dot_dimension_numbers<[2], [2], [1], [1], [0, 0, 0, 1, 1, 1], [0], [0]>} : vector<2x8x64xbf16>, vector<2x8x64xbf16>, vector<2x8x8xf32> -> vector<2x8x8xf32>
    "tpu.trace_stop"() : () -> ()
    %cst_20 = arith.constant dense<0xFF800000> : vector<2x8xf32>
    %57 = vector.multi_reduction <maximumf>, %56, %cst_20 [2] : vector<2x8x8xf32> to vector<2x8xf32>
    %58 = vector.shape_cast %57 : vector<2x8xf32> to vector<2x8x1xf32>
    %59 = vector.broadcast %58 : vector<2x8x1xf32> to vector<2x8x8xf32>
    %60 = arith.subf %56, %59 : vector<2x8x8xf32>
    %61 = math.exp %60 : vector<2x8x8xf32>
    %cst_21 = arith.constant dense<0.000000e+00> : vector<2x8xf32>
    %62 = vector.multi_reduction <add>, %61, %cst_21 [2] : vector<2x8x8xf32> to vector<2x8xf32>
    %63 = vector.shape_cast %62 : vector<2x8xf32> to vector<2x8x1xf32>
    %64 = tpu.reciprocal %63 {approx = true} : vector<2x8x1xf32> -> vector<2x8x1xf32>
    %65 = vector.broadcast %64 : vector<2x8x1xf32> to vector<2x8x8xf32>
    %66 = arith.mulf %61, %65 : vector<2x8x8xf32>
    %67 = arith.truncf %66 : vector<2x8x8xf32> to vector<2x8x8xbf16>
    "tpu.trace_start"() <{level = 10 : i32, message = "bqk,bkd->bqd"}> : () -> ()
    %cst_22 = arith.constant dense<0.000000e+00> : vector<2x8x64xf32>
    %68 = tpu.matmul %67, %55, %cst_22 {dimension_numbers = #tpu.dot_dimension_numbers<[2], [1], [1], [2], [0, 0, 0, 1, 1, 2], [0], [0]>} : vector<2x8x8xbf16>, vector<2x8x64xbf16>, vector<2x8x64xf32> -> vector<2x8x64xf32>
    "tpu.trace_stop"() : () -> ()
    %69 = vector.extract_strided_slice %16 {offsets = [0, 0, 192], sizes = [2, 8, 64], strides = [1, 1, 1]} : vector<2x8x256xbf16> to vector<2x8x64xbf16>
    %70 = vector.extract_strided_slice %18 {offsets = [0, 0, 192], sizes = [2, 8, 64], strides = [1, 1, 1]} : vector<2x8x256xbf16> to vector<2x8x64xbf16>
    %71 = vector.extract_strided_slice %20 {offsets = [0, 0, 192], sizes = [2, 8, 64], strides = [1, 1, 1]} : vector<2x8x256xbf16> to vector<2x8x64xbf16>
    "tpu.trace_start"() <{level = 10 : i32, message = "bqd,bkd->bqk"}> : () -> ()
    %cst_23 = arith.constant dense<0.000000e+00> : vector<2x8x8xf32>
    %72 = tpu.matmul %69, %70, %cst_23 {dimension_numbers = #tpu.dot_dimension_numbers<[2], [2], [1], [1], [0, 0, 0, 1, 1, 1], [0], [0]>} : vector<2x8x64xbf16>, vector<2x8x64xbf16>, vector<2x8x8xf32> -> vector<2x8x8xf32>
    "tpu.trace_stop"() : () -> ()
    %cst_24 = arith.constant dense<0xFF800000> : vector<2x8xf32>
    %73 = vector.multi_reduction <maximumf>, %72, %cst_24 [2] : vector<2x8x8xf32> to vector<2x8xf32>
    %74 = vector.shape_cast %73 : vector<2x8xf32> to vector<2x8x1xf32>
    %75 = vector.broadcast %74 : vector<2x8x1xf32> to vector<2x8x8xf32>
    %76 = arith.subf %72, %75 : vector<2x8x8xf32>
    %77 = math.exp %76 : vector<2x8x8xf32>
    %cst_25 = arith.constant dense<0.000000e+00> : vector<2x8xf32>
    %78 = vector.multi_reduction <add>, %77, %cst_25 [2] : vector<2x8x8xf32> to vector<2x8xf32>
    %79 = vector.shape_cast %78 : vector<2x8xf32> to vector<2x8x1xf32>
    %80 = tpu.reciprocal %79 {approx = true} : vector<2x8x1xf32> -> vector<2x8x1xf32>
    %81 = vector.broadcast %80 : vector<2x8x1xf32> to vector<2x8x8xf32>
    %82 = arith.mulf %77, %81 : vector<2x8x8xf32>
    %83 = arith.truncf %82 : vector<2x8x8xf32> to vector<2x8x8xbf16>
    "tpu.trace_start"() <{level = 10 : i32, message = "bqk,bkd->bqd"}> : () -> ()
    %cst_26 = arith.constant dense<0.000000e+00> : vector<2x8x64xf32>
    %84 = tpu.matmul %83, %71, %cst_26 {dimension_numbers = #tpu.dot_dimension_numbers<[2], [1], [1], [2], [0, 0, 0, 1, 1, 2], [0], [0]>} : vector<2x8x8xbf16>, vector<2x8x64xbf16>, vector<2x8x64xf32> -> vector<2x8x64xf32>
    "tpu.trace_stop"() : () -> ()
    %85 = tpu.concatenate %36, %52, %68, %84 in 2 : vector<2x8x64xf32>, vector<2x8x64xf32>, vector<2x8x64xf32>, vector<2x8x64xf32> -> vector<2x8x256xf32>
    %86 = vector.shape_cast %85 : vector<2x8x256xf32> to vector<16x256xf32>
    %87 = arith.truncf %86 : vector<16x256xf32> to vector<16x256xbf16>
    %cst_27 = arith.constant dense<0.000000e+00> : vector<16x256xf32>
    %88 = tpu.matmul %87, %11, %cst_27 {dimension_numbers = #tpu.dot_dimension_numbers<[1], [0], [0], [1], [0, 0, 1, 1], [], []>} : vector<16x256xbf16>, vector<256x256xbf16>, vector<16x256xf32> -> vector<16x256xf32>
    %89 = vector.broadcast %12 : vector<1x256xf32> to vector<16x256xf32>
    %90 = arith.addf %88, %89 : vector<16x256xf32>
    %91 = vector.shape_cast %90 : vector<16x256xf32> to vector<2x8x256xf32>
    %c0_28 = arith.constant 0 : index
    %c0_29 = arith.constant 0 : index
    %c0_30 = arith.constant 0 : index
    %92 = vector.load %arg6[%c0_28, %c0_29, %c0_30] : memref<2x8x256xf32, #tpu.memory_space<vmem>>, vector<2x8x256xf32>
    tpu.vector_store %arg6[%c0_28, %c0_29, %c0_30], %91 {strides = array<i32>} : memref<2x8x256xf32, #tpu.memory_space<vmem>>, vector<2x8x256xf32>,
    return
  }
  func.func @transform_0(%arg0: i32) -> (i32, i32, i32) {
    %c0_i32 = arith.constant 0 : i32
    %c0_i32_0 = arith.constant 0 : i32
    %c0_i32_1 = arith.constant 0 : i32
    %c0_i32_2 = arith.constant 0 : i32
    return %c0_i32, %c0_i32_0, %c0_i32_1 : i32, i32, i32
  }
  func.func @transform_1(%arg0: i32) -> (i32, i32) {
    %c0_i32 = arith.constant 0 : i32
    %c0_i32_0 = arith.constant 0 : i32
    %c0_i32_1 = arith.constant 0 : i32
    return %c0_i32, %c0_i32_0 : i32, i32
  }
  func.func @transform_2(%arg0: i32) -> (i32, i32) {
    %c0_i32 = arith.constant 0 : i32
    %c0_i32_0 = arith.constant 0 : i32
    %c0_i32_1 = arith.constant 0 : i32
    return %c0_i32, %c0_i32_0 : i32, i32
  }
  func.func @transform_3(%arg0: i32) -> (i32, i32) {
    %c0_i32 = arith.constant 0 : i32
    %c0_i32_0 = arith.constant 0 : i32
    %c0_i32_1 = arith.constant 0 : i32
    return %c0_i32, %c0_i32_0 : i32, i32
  }
  func.func @transform_4(%arg0: i32) -> (i32, i32) {
    %c0_i32 = arith.constant 0 : i32
    %c0_i32_0 = arith.constant 0 : i32
    %c0_i32_1 = arith.constant 0 : i32
    return %c0_i32, %c0_i32_0 : i32, i32
  }
  func.func @transform_5(%arg0: i32) -> (i32, i32, i32) {
    %c0_i32 = arith.constant 0 : i32
    %c0_i32_0 = arith.constant 0 : i32
    %c0_i32_1 = arith.constant 0 : i32
    %c0_i32_2 = arith.constant 0 : i32
    return %c0_i32, %c0_i32_0, %c0_i32_1 : i32, i32, i32
  }
}

</mosaic_0001>

<bundles_post_ra>
// kernel: tpu_custom_call.1
= control target key start
LH: loop header
LB: loop body
LE: loop exit
PB: predicated region body
PF: predicated region fallthrough
CT: control target
= control target key end

     0   :  { %10 = vsyncpa [#allocation3], 0  ;;  %s2900_s0 = inlined_call_operand.hbm [shape: f32[2,8,256], index: 0, kind: input, shape index: {}]   ;;  %s2901_s1 = inlined_call_operand.hbm [shape: bf16[256,768], index: 1, kind: input, shape index: {}]   ;;  %s2902_s2 = inlined_call_operand.hbm [shape: f32[1,768], index: 2, kind: input, shape index: {}]   ;;  %s2903_s3 = inlined_call_operand.hbm [shape: bf16[256,256], index: 3, kind: input, shape index: {}]   ;;  %s2904_s4 = inlined_call_operand.vmem [shape: f32[1,256], index: 4, kind: input, shape index: {}]   ;;  %s2905_s5 = inlined_call_operand.hbm [shape: f32[2,8,256], index: 5, kind: output, shape index: {}]  }
   0x1   :  { %11 = vsyncpa [#allocation6], 0 }
   0x2   :  { %12 = vsyncpa [#allocation9], 0 }
   0x3   :  { %13 = vsyncpa [#allocation4], 0  ;;  %s2625_s18 = smov [#allocation5]  }
   0x4   :  { %s31_s19 = sshll.u32 %s2625_s18, 4  ;;  %s32_s19 = int_to_ptr.vmem [resolvable:$true] %s31_s19 }
   0x5   :  { %s2525_s20 = scalar_lea.vmem %s32_s19, 12288  ;;  %p2530_p1 = scmp.lt.s32.totalorder %s32_s19, %s32_s19 }
   0x6   :  { %p2526_p0 = scmp.ne.s32.totalorder %s32_s19, %s2525_s20  ;;  %p2531_p2 = scmp.lt.s32.totalorder %s2525_s20, %s2525_s20 }
   0x8   :  { %p2532_p3 = por %p2531_p2, %p2530_p1 }
   0xa   :  { %p2533_p4 = pnand %p2532_p3, %p2526_p0 }
   0xc   :  { %2536 = shalt.err (!%p2533_p4)
}
   0xd   :  { %s2626_s21 = smov 384   ;;  %s2627_s22 = smov 24  }
   0xe   :  { %37 = dma.hbm_to_vmem [thread:$0]  %s2901_s1, 12288, %s32_s19, [#allocation6], %s2626_s21, %s2626_s21, %s2627_s22  }
   0xf   :  { %s2628_s25 = smov [#allocation2]  }
  0x10   :  { %s19_s26 = sshll.u32 %s2628_s25, 4  ;;  %s20_s26 = int_to_ptr.vmem [resolvable:$true] %s19_s26 }
  0x11   :  { %s2545_s27 = scalar_lea.vmem %s20_s26, 512  ;;  %p2550_p6 = scmp.lt.s32.totalorder %s20_s26, %s20_s26 }
  0x12   :  { %p2546_p5 = scmp.ne.s32.totalorder %s20_s26, %s2545_s27  ;;  %p2551_p7 = scmp.lt.s32.totalorder %s2545_s27, %s2545_s27 }
  0x14   :  { %p2552_p8 = por %p2551_p7, %p2550_p6 }
  0x16   :  { %p2553_p9 = pnand %p2552_p8, %p2546_p5 }
  0x18   :  { %2556 = shalt.err (!%p2553_p9)
}
  0x19   :  { %s2629_s28 = smov 256   ;;  %s2630_s29 = smov 16  }
  0x1a   :  { %25 = dma.hbm_to_vmem [thread:$0]  %s2900_s0, 512, %s20_s26, [#allocation3], %s2629_s28, %s2629_s28, %s2630_s29  }
  0x1b   :  { %s2631_s1 = smov [#allocation7]   ;;  %s2632_s8 = smov [#allocation8]  }
  0x1c   :  { %s44_s7 = sshll.u32 %s2631_s1, 4  ;;  %s53_s9 = sshll.u32 %s2632_s8, 4  ;;  %s45_s7 = int_to_ptr.vmem [resolvable:$true] %s44_s7  ;;  %s54_s9 = int_to_ptr.vmem [resolvable:$true] %s53_s9 }
  0x1d   :  { %s2565_s10 = scalar_lea.vmem %s45_s7, 96  ;;  %p2570_p11 = scmp.lt.s32.totalorder %s45_s7, %s45_s7 }
  0x1e   :  { %p2566_p10 = scmp.ne.s32.totalorder %s45_s7, %s2565_s10  ;;  %p2571_p12 = scmp.lt.s32.totalorder %s2565_s10, %s2565_s10 }
  0x20   :  { %p2572_p13 = por %p2571_p12, %p2570_p11 }
  0x22   :  { %p2573_p0 = pnand %p2572_p13, %p2566_p10 }
  0x24   :  { %2576 = shalt.err (!%p2573_p0)
}
  0x25   :  { %47 = dma.hbm_to_vmem [thread:$0]  %s2902_s2, 96, %s45_s7, [#allocation6]  }
  0x26   :  { %s2585_s13 = scalar_lea.vmem %s54_s9, 4096  ;;  %p2590_p2 = scmp.lt.s32.totalorder %s54_s9, %s54_s9 }
  0x27   :  { %p2586_p1 = scmp.ne.s32.totalorder %s54_s9, %s2585_s13  ;;  %p2591_p3 = scmp.lt.s32.totalorder %s2585_s13, %s2585_s13 }
  0x29   :  { %p2592_p4 = por %p2591_p3, %p2590_p2 }
  0x2b   :  { %p2593_p5 = pnand %p2592_p4, %p2586_p1 }
  0x2d   :  { %2596 = shalt.err (!%p2593_p5)
}
  0x2e   :  { %s2633_s0 = smov 128   ;;  %s2634_s14 = smov 8  }
  0x2f   :  { %59 = dma.hbm_to_vmem [thread:$0]  %s2903_s3, 4096, %s54_s9, [#allocation9], %s2633_s0, %s2633_s0, %s2634_s14  }
  0x30   :  { %2617 = dma.done.wait [#allocation3], 512  }
  0x31   :  { %2618 = vsyncadd [#allocation3], 4294966784 }
  0x32   :  { %2619 = dma.done.wait [#allocation6], 12384  }
  0x33   :  { %2620 = vsyncadd [#allocation6], 4294954912 }
  0x34   :  { %2621 = dma.done.wait [#allocation9], 4096  }
  0x35   :  { %2622 = vsyncadd [#allocation9], 4294963200  ;;  %v2293_v0 = vld [vmem:[#allocation5 + $0x154] ss:$24 sps:$4 sm:$0xff]   ;;  %v2297_v2 = vld [vmem:[#allocation5 + $0x150] ss:$24 sps:$4 sm:$0xff]  }
  0x36   :  { %v2295_v1 = vld [vmem:[#allocation5 + $0x15c] ss:$24 sps:$4 sm:$0xff]   ;;  %689 = vmatprep.subr.bf16.mxu0 %v2293_v0  ;;  %v2298_v3 = vld [vmem:[#allocation5 + $0x158] ss:$24 sps:$4 sm:$0xff]   ;;  %v2301_v5 = vld [vmem:[#allocation5 + $0x12c] ss:$24 sps:$4 sm:$0xff]  }
  0x37   :  { %732 = vmatprep.subr.bf16.mxu1 %v2295_v1  ;;  %v2299_v4 = vld [vmem:[#allocation5 + $0x124] ss:$24 sps:$4 sm:$0xff]   ;;  %690 = vmatpush1.bf16.msra.mxu0 %v2297_v2  ;;  %v2303_v6 = vld [vmem:[#allocation5 + $0x120] ss:$24 sps:$4 sm:$0xff]   ;;  %v2305_v8 = vld [vmem:[#allocation5 + $0xf4] ss:$24 sps:$4 sm:$0xff]  }
  0x38   :  { %733 = vmatpush1.bf16.msra.mxu1 %v2298_v3  ;;  %691 = vmatprep.subr.bf16.mxu0 %v2299_v4  ;;  %v2304_v7 = vld [vmem:[#allocation5 + $0x128] ss:$24 sps:$4 sm:$0xff]   ;;  %v2307_v9 = vld [vmem:[#allocation5 + $0xfc] ss:$24 sps:$4 sm:$0xff]   ;;  %v2310_v11 = vld [vmem:[#allocation5 + $0xf8] ss:$24 sps:$4 sm:$0xff]  }
  0x39   :  { %734 = vmatprep.subr.bf16.mxu1 %v2301_v5  ;;  %v2309_v10 = vld [vmem:[#allocation5 + $0xf0] ss:$24 sps:$4 sm:$0xff]   ;;  %v2311_v12 = vld [vmem:[#allocation5 + $0xc4] ss:$24 sps:$4 sm:$0xff]   ;;  %v2315_v14 = vld [vmem:[#allocation5 + $0xc0] ss:$24 sps:$4 sm:$0xff]  }
  0x3a   :  { %v2313_v13 = vld [vmem:[#allocation5 + $0xcc] ss:$24 sps:$4 sm:$0xff]   ;;  %v2316_v15 = vld [vmem:[#allocation5 + $0xc8] ss:$24 sps:$4 sm:$0xff]   ;;  %v2319_v17 = vld [vmem:[#allocation5 + $0x9c] ss:$24 sps:$4 sm:$0xff]  }
  0x3b   :  { %692 = vmatpush1.bf16.msra.mxu0 %v2303_v6  ;;  %v2317_v16 = vld [vmem:[#allocation5 + $0x94] ss:$24 sps:$4 sm:$0xff]   ;;  %v2321_v18 = vld [vmem:[#allocation5 + $0x90] ss:$24 sps:$4 sm:$0xff]   ;;  %v2323_v20 = vld [vmem:[#allocation5 + $0x64] ss:$24 sps:$4 sm:$0xff]  }
  0x3c   :  { %735 = vmatpush1.bf16.msra.mxu1 %v2304_v7  ;;  %693 = vmatprep.subr.bf16.mxu0 %v2305_v8  ;;  %v2322_v19 = vld [vmem:[#allocation5 + $0x98] ss:$24 sps:$4 sm:$0xff]   ;;  %v2325_v21 = vld [vmem:[#allocation5 + $0x6c] ss:$24 sps:$4 sm:$0xff]   ;;  %v2328_v23 = vld [vmem:[#allocation5 + $0x68] ss:$24 sps:$4 sm:$0xff]   ;;  %v179_v7 = vlaneseq }
  0x3d   :  { %736 = vmatprep.subr.bf16.mxu1 %v2307_v9  ;;  %v2327_v22 = vld [vmem:[#allocation5 + $0x60] ss:$24 sps:$4 sm:$0xff]   ;;  %v2329_v24 = vld [vmem:[#allocation5 + $0x34] ss:$24 sps:$4 sm:$0xff]   ;;  %v2333_v26 = vld [vmem:[#allocation5 + $0x30] ss:$24 sps:$4 sm:$0xff]  }
  0x3e   :  { %v2331_v25 = vld [vmem:[#allocation5 + $0x3c] ss:$24 sps:$4 sm:$0xff]   ;;  %v2334_v27 = vld [vmem:[#allocation5 + $0x38] ss:$24 sps:$4 sm:$0xff]   ;;  %v2337_v29 = vld [vmem:[#allocation5 + $0xc] ss:$24 sps:$4 sm:$0xff]  }
  0x3f   :  { %694 = vmatpush1.bf16.msra.mxu0 %v2309_v10  ;;  %v2335_v28 = vld [vmem:[#allocation5 + $0x4] ss:$24 sps:$4 sm:$0xff]   ;;  %v2339_v30 = vld [vmem:[#allocation5] ss:$24 sps:$4 sm:$0xff]   ;;  %v2341_v32 = vld [vmem:[#allocation5 + $0x2d4] ss:$24 sps:$4 sm:$0xff]  }
  0x40   :  { %737 = vmatpush1.bf16.msra.mxu1 %v2310_v11  ;;  %695 = vmatprep.subr.bf16.mxu0 %v2311_v12  ;;  %v2340_v31 = vld [vmem:[#allocation5 + $0x8] ss:$24 sps:$4 sm:$0xff]   ;;  %v2343_v33 = vld [vmem:[#allocation5 + $0x2dc] ss:$24 sps:$4 sm:$0xff]   ;;  %v2346_v35 = vld [vmem:[#allocation5 + $0x2d8] ss:$24 sps:$4 sm:$0xff]  }
  0x41   :  { %738 = vmatprep.subr.bf16.mxu1 %v2313_v13  ;;  %v2345_v34 = vld [vmem:[#allocation5 + $0x2d0] ss:$24 sps:$4 sm:$0xff]   ;;  %v2347_v36 = vld [vmem:[#allocation5 + $0x2a4] ss:$24 sps:$4 sm:$0xff]   ;;  %v2351_v38 = vld [vmem:[#allocation5 + $0x2a0] ss:$24 sps:$4 sm:$0xff]  }
  0x42   :  { %v2349_v37 = vld [vmem:[#allocation5 + $0x2ac] ss:$24 sps:$4 sm:$0xff]   ;;  %v2352_v39 = vld [vmem:[#allocation5 + $0x2a8] ss:$24 sps:$4 sm:$0xff]   ;;  %v2355_v41 = vld [vmem:[#allocation5 + $0x27c] ss:$24 sps:$4 sm:$0xff]  }
  0x43   :  { %696 = vmatpush1.bf16.msra.mxu0 %v2315_v14  ;;  %v2353_v40 = vld [vmem:[#allocation5 + $0x274] ss:$24 sps:$4 sm:$0xff]   ;;  %v2357_v42 = vld [vmem:[#allocation5 + $0x270] ss:$24 sps:$4 sm:$0xff]   ;;  %v2359_v44 = vld [vmem:[#allocation5 + $0x244] ss:$24 sps:$4 sm:$0xff]  }
  0x44   :  { %739 = vmatpush1.bf16.msra.mxu1 %v2316_v15  ;;  %697 = vmatprep.subr.bf16.mxu0 %v2317_v16  ;;  %v2358_v43 = vld [vmem:[#allocation5 + $0x278] ss:$24 sps:$4 sm:$0xff]   ;;  %v2361_v45 = vld [vmem:[#allocation5 + $0x24c] ss:$24 sps:$4 sm:$0xff]   ;;  %v2364_v48 = vld [vmem:[#allocation5 + $0x248] ss:$24 sps:$4 sm:$0xff]  }
  0x45   :  { %740 = vmatprep.subr.bf16.mxu1 %v2319_v17  ;;  %v2363_v46 = vld [vmem:[#allocation5 + $0x240] ss:$24 sps:$4 sm:$0xff]   ;;  %v76_v47 = vld [vmem:[#allocation2 + $0x8] sm:$0xff]  ;;  %v2367_v51 = vld [vmem:[#allocation5 + $0x21c] ss:$24 sps:$4 sm:$0xff]   ;;  %v2635_v6 = vmov 0.0  }
  0x46   :  { %v2365_v49 = vld [vmem:[#allocation5 + $0x214] ss:$24 sps:$4 sm:$0xff]   ;;  %v78_v50 = vld [vmem:[#allocation2 + $0x18] sm:$0xff]  ;;  %v2369_v53 = vld [vmem:[#allocation5 + $0x210] ss:$24 sps:$4 sm:$0xff]   ;;  %vm2636_vm0 = vmmov 0  }
  0x47   :  { %698 = vmatpush1.bf16.msra.mxu0 %v2321_v18  ;;  %v80_v52 = vpack.c.bf16 %v78_v50, %v76_v47  ;;  %v2370_v54 = vld [vmem:[#allocation5 + $0x218] ss:$24 sps:$4 sm:$0xff]   ;;  %v2371_v55 = vld [vmem:[#allocation5 + $0x1e4] ss:$24 sps:$4 sm:$0xff]   ;;  %v2376_v58 = vld [vmem:[#allocation5 + $0x1e8] ss:$24 sps:$4 sm:$0xff]  }
  0x48   :  { %741 = vmatpush1.bf16.msra.mxu1 %v2322_v19  ;;  %699 = vmatprep.subr.bf16.mxu0 %v2323_v20  ;;  %v2373_v56 = vld [vmem:[#allocation5 + $0x1ec] ss:$24 sps:$4 sm:$0xff]   ;;  %v2375_v57 = vld [vmem:[#allocation5 + $0x1e0] ss:$24 sps:$4 sm:$0xff]   ;;  %v2379_v60 = vld [vmem:[#allocation5 + $0x1bc] ss:$24 sps:$4 sm:$0xff]  }
  0x49   :  { %742 = vmatprep.subr.bf16.mxu1 %v2325_v21  ;;  %721 = vmatprep.mubr.bf16.mxu0 %v80_v52  ;;  %v2377_v59 = vld [vmem:[#allocation5 + $0x1b4] ss:$24 sps:$4 sm:$0xff]   ;;  %v2381_v61 = vld [vmem:[#allocation5 + $0x1b0] ss:$24 sps:$4 sm:$0xff]   ;;  %v2383_v63 = vld [vmem:[#allocation5 + $0x184] ss:$24 sps:$4 sm:$0xff]  }
  0x4a   :  { %764 = vmatprep.mubr.bf16.mxu1 %v80_v52  ;;  %v2382_v62 = vld [vmem:[#allocation5 + $0x1b8] ss:$24 sps:$4 sm:$0xff]   ;;  %v2385_v0 = vld [vmem:[#allocation5 + $0x18c] ss:$24 sps:$4 sm:$0xff]   ;;  %v2388_v2 = vld [vmem:[#allocation5 + $0x188] ss:$24 sps:$4 sm:$0xff]  }
  0x4b   :  { %700 = vmatpush1.bf16.msra.mxu0 %v2327_v22  ;;  %v2387_v1 = vld [vmem:[#allocation5 + $0x180] ss:$24 sps:$4 sm:$0xff]   ;;  %v77_v4 = vld [vmem:[#allocation2 + $0x10] sm:$0xff]  ;;  %v2691_v8 = vshrl.u32 %v179_v7, 7  ;;  %vm867_vm1 = vcmask 523264   ;;  %vm960_vm2 = vcmask 64512  }
  0x4c   :  { %743 = vmatpush1.bf16.msra.mxu1 %v2328_v23  ;;  %701 = vmatprep.subr.bf16.mxu0 %v2329_v24  ;;  %v75_v3 = vld [vmem:[#allocation2] sm:$0xff]  ;;  %v2410_v47 = vld [vmem:[#allocation5 + $0x10] ss:$24 sps:$4 sm:$0xff]   ;;  %v2418_v50 = vld [vmem:[#allocation5 + $0x2b4] ss:$24 sps:$4 sm:$0xff]   ;;  %s2637_s2 = smov 64  }
  0x4d   :  { %744 = vmatprep.subr.bf16.mxu1 %v2331_v25  ;;  %v2684_v5 = vpack.c.bf16 %v77_v4, %v75_v3  ;;  %v181_v9 = vsub.s32 0, %v2691_v8  ;;  %v189_v10 = vsub.s32 2, %v2691_v8  ;;  %v2695_v11 = vld [vmem:[#allocation7] sm:$0x3f]  ;;  %vm988_vm3 = vcmask 1043456   ;;  %s2638_s18 = smov [#allocation10]  }
  0x4e   :  { %s1983_s19 = sshll.u32 %s2638_s18, 4  ;;  %s1984_s19 = int_to_ptr.vmem [resolvable:$true] %s1983_s19 }
  0x4f   :  { %702 = vmatpush1.bf16.msra.mxu0 %v2333_v26  ;;  %v182_v12 = vrot.slane %v2695_v11, %v181_v9  ;;  %v190_v13 = vrot.slane %v2695_v11, %v189_v10  ;;  %p2602_p7 = scmp.lt.s32.totalorder %s1984_s19, %s1984_s19 }
  0x50   :  { %745 = vmatpush1.bf16.msra.mxu1 %v2334_v27  ;;  %703 = vmatprep.subr.bf16.mxu0 %v2335_v28 }
  0x51   :  { %746 = vmatprep.subr.bf16.mxu1 %v2337_v29 }
  0x53   :  { %704 = vmatpush1.bf16.msra.mxu0 %v2339_v30 }
  0x54   :  { %747 = vmatpush1.bf16.msra.mxu1 %v2340_v31  ;;  %705 = vmatprep.subr.bf16.mxu0 %v2341_v32  ;;  %v2389_v32 = vld [vmem:[#allocation5 + $0x160] ss:$24 sps:$4 sm:$0xff]  }
  0x55   :  { %748 = vmatprep.subr.bf16.mxu1 %v2343_v33  ;;  %v2391_v33 = vld [vmem:[#allocation5 + $0x164] ss:$24 sps:$4 sm:$0xff]  }
  0x57   :  { %706 = vmatpush2.bf16.msra.mxu0 %v2345_v34  ;;  %v2394_v34 = vld [vmem:[#allocation5 + $0x134] ss:$24 sps:$4 sm:$0xff]  }
  0x58   :  { %749 = vmatpush2.bf16.msra.mxu1 %v2346_v35  ;;  %707 = vmatprep.subr.bf16.mxu0 %v2347_v36  ;;  %v2392_v35 = vld [vmem:[#allocation5 + $0x130] ss:$24 sps:$4 sm:$0xff]   ;;  %v2397_v36 = vld [vmem:[#allocation5 + $0x104] ss:$24 sps:$4 sm:$0xff]  }
  0x59   :  { %750 = vmatprep.subr.bf16.mxu1 %v2349_v37  ;;  %v2395_v37 = vld [vmem:[#allocation5 + $0x100] ss:$24 sps:$4 sm:$0xff]  }
  0x5b   :  { %708 = vmatpush2.bf16.msra.mxu0 %v2351_v38  ;;  %v2400_v38 = vld [vmem:[#allocation5 + $0xd4] ss:$24 sps:$4 sm:$0xff]  }
  0x5c   :  { %751 = vmatpush2.bf16.msra.mxu1 %v2352_v39  ;;  %709 = vmatprep.subr.bf16.mxu0 %v2353_v40  ;;  %v2398_v39 = vld [vmem:[#allocation5 + $0xd0] ss:$24 sps:$4 sm:$0xff]   ;;  %v2403_v40 = vld [vmem:[#allocation5 + $0xa4] ss:$24 sps:$4 sm:$0xff]  }
  0x5d   :  { %752 = vmatprep.subr.bf16.mxu1 %v2355_v41  ;;  %v2401_v41 = vld [vmem:[#allocation5 + $0xa0] ss:$24 sps:$4 sm:$0xff]  }
  0x5f   :  { %710 = vmatpush2.bf16.msra.mxu0 %v2357_v42  ;;  %v2406_v42 = vld [vmem:[#allocation5 + $0x74] ss:$24 sps:$4 sm:$0xff]  }
  0x60   :  { %753 = vmatpush2.bf16.msra.mxu1 %v2358_v43  ;;  %711 = vmatprep.subr.bf16.mxu0 %v2359_v44  ;;  %v2404_v43 = vld [vmem:[#allocation5 + $0x70] ss:$24 sps:$4 sm:$0xff]   ;;  %v2409_v44 = vld [vmem:[#allocation5 + $0x44] ss:$24 sps:$4 sm:$0xff]  }
  0x61   :  { %754 = vmatprep.subr.bf16.mxu1 %v2361_v45  ;;  %v2407_v45 = vld [vmem:[#allocation5 + $0x40] ss:$24 sps:$4 sm:$0xff]  }
  0x63   :  { %712 = vmatpush2.bf16.msra.mxu0 %v2363_v46  ;;  %v2412_v46 = vld [vmem:[#allocation5 + $0x14] ss:$24 sps:$4 sm:$0xff]  }
  0x64   :  { %755 = vmatpush2.bf16.msra.mxu1 %v2364_v48  ;;  %713 = vmatprep.subr.bf16.mxu0 %v2365_v49  ;;  %v2415_v48 = vld [vmem:[#allocation5 + $0x2e4] ss:$24 sps:$4 sm:$0xff]   ;;  %v2413_v49 = vld [vmem:[#allocation5 + $0x2e0] ss:$24 sps:$4 sm:$0xff]  }
  0x65   :  { %756 = vmatprep.subr.bf16.mxu1 %v2367_v51  ;;  %v2416_v51 = vld [vmem:[#allocation5 + $0x2b0] ss:$24 sps:$4 sm:$0xff]  }
  0x67   :  { %714 = vmatpush2.bf16.msra.mxu0 %v2369_v53  ;;  %v2419_v53 = vld [vmem:[#allocation5 + $0x280] ss:$24 sps:$4 sm:$0xff]  }
  0x68   :  { %757 = vmatpush2.bf16.msra.mxu1 %v2370_v54  ;;  %715 = vmatprep.subr.bf16.mxu0 %v2371_v55  ;;  %v2424_v54 = vld [vmem:[#allocation5 + $0x254] ss:$24 sps:$4 sm:$0xff]   ;;  %v2422_v55 = vld [vmem:[#allocation5 + $0x250] ss:$24 sps:$4 sm:$0xff]  }
  0x69   :  { %758 = vmatprep.subr.bf16.mxu1 %v2373_v56  ;;  %v2427_v56 = vld [vmem:[#allocation5 + $0x224] ss:$24 sps:$4 sm:$0xff]  }
  0x6b   :  { %716 = vmatpush2.bf16.msra.mxu0 %v2375_v57  ;;  %v2425_v57 = vld [vmem:[#allocation5 + $0x220] ss:$24 sps:$4 sm:$0xff]  }
  0x6c   :  { %759 = vmatpush2.bf16.msra.mxu1 %v2376_v58  ;;  %717 = vmatprep.subr.bf16.mxu0 %v2377_v59  ;;  %v2430_v58 = vld [vmem:[#allocation5 + $0x1f4] ss:$24 sps:$4 sm:$0xff]   ;;  %v2428_v59 = vld [vmem:[#allocation5 + $0x1f0] ss:$24 sps:$4 sm:$0xff]  }
  0x6d   :  { %760 = vmatprep.subr.bf16.mxu1 %v2379_v60  ;;  %v2433_v60 = vld [vmem:[#allocation5 + $0x1c4] ss:$24 sps:$4 sm:$0xff]  }
  0x6f   :  { %718 = vmatpush2.bf16.msra.mxu0 %v2381_v61  ;;  %v2431_v61 = vld [vmem:[#allocation5 + $0x1c0] ss:$24 sps:$4 sm:$0xff]  }
  0x70   :  { %761 = vmatpush2.bf16.msra.mxu1 %v2382_v62  ;;  %719 = vmatprep.subr.bf16.mxu0 %v2383_v63  ;;  %v2436_v62 = vld [vmem:[#allocation5 + $0x194] ss:$24 sps:$4 sm:$0xff]   ;;  %v2434_v63 = vld [vmem:[#allocation5 + $0x190] ss:$24 sps:$4 sm:$0xff]  }
  0x71   :  { %762 = vmatprep.subr.bf16.mxu1 %v2385_v0 }
  0x73   :  { %720 = vmatpush2.bf16.msra.mxu0 %v2387_v1 }
  0x74   :  { %763 = vmatpush2.bf16.msra.mxu1 %v2388_v2  ;;  %775 = vmatprep.subr.bf16.mxu0 %v2391_v33 }
  0x75   :  { %2173 = vmatprep.subr.bf16.mxu1 %v2635_v6 }
  0x76   :  { %722 = vmatmul.mubr.bf16.vlgmr.msra.gmra.mxu0 %v2684_v5 }
  0x77   :  { %765 = vmatmul.mubr.bf16.vlgmr.msra.gmra.mxu1 %v2684_v5  ;;  %807 = vmatprep.mubr.bf16.mxu0 %v80_v52  ;;  %v2421_v52 = vld [vmem:[#allocation5 + $0x284] ss:$24 sps:$4 sm:$0xff]  }
  0x78   :  { %2175 = vmatprep.mubr.msk.bf16.mxu1 %vm2636_vm0, %v2635_v6  ;;  %776 = vmatpush1.bf16.msra.mxu0 %v2389_v32 }
  0x79   :  { %777 = vmatprep.subr.bf16.mxu0 %v2394_v34 }
  0x7c   :  { %778 = vmatpush1.bf16.msra.mxu0 %v2392_v35 }
  0x7d   :  { %779 = vmatprep.subr.bf16.mxu0 %v2397_v36 }
  0x80   :  { %780 = vmatpush1.bf16.msra.mxu0 %v2395_v37 }
  0x81   :  { %781 = vmatprep.subr.bf16.mxu0 %v2400_v38 }
  0x84   :  { %782 = vmatpush1.bf16.msra.mxu0 %v2398_v39 }
  0x85   :  { %783 = vmatprep.subr.bf16.mxu0 %v2403_v40 }
  0x88   :  { %784 = vmatpush1.bf16.msra.mxu0 %v2401_v41 }
  0x89   :  { %785 = vmatprep.subr.bf16.mxu0 %v2406_v42 }
  0x8c   :  { %786 = vmatpush1.bf16.msra.mxu0 %v2404_v43 }
  0x8d   :  { %787 = vmatprep.subr.bf16.mxu0 %v2409_v44 }
  0x90   :  { %788 = vmatpush1.bf16.msra.mxu0 %v2407_v45 }
  0x91   :  { %789 = vmatprep.subr.bf16.mxu0 %v2412_v46 }
  0x94   :  { %790 = vmatpush1.bf16.msra.mxu0 %v2410_v47 }
  0x95   :  { %791 = vmatprep.subr.bf16.mxu0 %v2415_v48 }
  0x98   :  { %792 = vmatpush2.bf16.msra.mxu0 %v2413_v49 }
  0x99   :  { %793 = vmatprep.subr.bf16.mxu0 %v2418_v50 }
  0x9c   :  { %794 = vmatpush2.bf16.msra.mxu0 %v2416_v51 }
  0x9d   :  { %795 = vmatprep.subr.bf16.mxu0 %v2421_v52 }
  0xa0   :  { %796 = vmatpush2.bf16.msra.mxu0 %v2419_v53 }
  0xa1   :  { %797 = vmatprep.subr.bf16.mxu0 %v2424_v54 }
  0xa4   :  { %798 = vmatpush2.bf16.msra.mxu0 %v2422_v55 }
  0xa5   :  { %799 = vmatprep.subr.bf16.mxu0 %v2427_v56 }
  0xa8   :  { %800 = vmatpush2.bf16.msra.mxu0 %v2425_v57 }
  0xa9   :  { %801 = vmatprep.subr.bf16.mxu0 %v2430_v58 }
  0xac   :  { %802 = vmatpush2.bf16.msra.mxu0 %v2428_v59 }
  0xad   :  { %803 = vmatprep.subr.bf16.mxu0 %v2433_v60 }
  0xb0   :  { %804 = vmatpush2.bf16.msra.mxu0 %v2431_v61 }
  0xb1   :  { %805 = vmatprep.subr.bf16.mxu0 %v2436_v62 }
  0xb4   :  { %806 = vmatpush2.bf16.msra.mxu0 %v2434_v63 }
  0xb7   :  { %808 = vmatmul.mubr.bf16.vlgmr.msra.gmra.mxu0 %v2684_v5 }
 0x136   :  { %v723_v14 = vpop.f32.mrf.mxu0 }
 0x137   :  { %v766_v15 = vpop.f32.mrf.mxu1  ;;  %v724_v16 = vadd.f32 %v723_v14, %v182_v12 }
 0x138   :  { %v767_v17 = vadd.f32 %v766_v15, %v190_v13  ;;  %v2707_v23 = vpop.f32.mrf.mxu0 }
 0x139   :  { %v2701_v18 = vpop.f32.mrf.mxu1  ;;  %v851_v21 = vmul.f32 0.125, %v724_v16 }
 0x13a   :  { %v2703_v19 = vpack.c.bf16 %v767_v17, %v767_v17  ;;  %v727_v27 = vpop.f32.mrf.mxu0 }
 0x13b   :  { %v770_v20 = vpop.f32.mrf.mxu1  ;;  %v2710_v25 = vpack.c.bf16 %v851_v21, %v851_v21  ;;  %v728_v28 = vadd.f32 %v727_v27, %v182_v12 }
 0x13c   :  { %v872_v22 = vsel %vm867_vm1, %v2703_v19, 0  ;;  %v771_v24 = vadd.f32 %v770_v20, %v190_v13  ;;  %v2737_v32 = vpop.f32.mrf.mxu0 }
 0x13d   :  { %2174 = vmatpush3.bf16.xpose.msra.mxu1 %v872_v22  ;;  %v853_v30 = vmul.f32 0.125, %v728_v28  ;;  %v2728_v0 = vpop.f32.mrf.mxu1 }
 0x13e   :  { %2179 = vmatprep.subr.bf16.mxu1 %v2635_v6  ;;  %v2712_v26 = vpack.c.bf16 %v771_v24, %v771_v24 }
 0x13f   :  { %v2721_v31 = vpack.c.bf16 %v853_v30, %v853_v30  ;;  %v197_v30 = vsub.s32 4, %v2691_v8 }
 0x140   :  { %v918_v29 = vsel %vm867_vm1, %v2712_v26, 0 }
 0x144   :  { %2176 = vmatmul.mubr.msk.bf16.vlgmr.msra.gmra.mxu1 %vm867_vm1, %v2710_v25 }
 0x145   :  { %2180 = vmatpush3.bf16.xpose.msra.mxu1 %v918_v29  ;;  %2181 = vmatprep.mubr.msk.bf16.mxu1 %vm2636_vm0, %v2635_v6 }
 0x146   :  { %2185 = vmatprep.subr.bf16.mxu1 %v2635_v6 }
 0x14c   :  { %2182 = vmatmul.mubr.msk.bf16.vlgmr.msra.gmra.mxu1 %vm867_vm1, %v2721_v31 }
 0x14d   :  { %2187 = vmatprep.mubr.msk.bf16.mxu1 %vm2636_vm0, %v2635_v6 }
 0x177   :  { %v809_v33 = vpop.f32.mrf.mxu0 }
 0x179   :  { %v2751_v38 = vpop.f32.mrf.mxu0 }
 0x17b   :  { %v813_v40 = vpop.f32.mrf.mxu0 }
 0x204   :  { %v908_v1 = vpop.f32.mrf.mxu1 }
 0x205   :  { %v961_v2 = vsel %vm960_vm2, %v908_v1, -inf }
 0x206   :  { %962 = vmax.xlane.f32.xlu0 %v961_v2  ;;  %v2177_v3 = vpop.f32.mrf.mxu1 }
 0x208   :  { %v911_v4 = vpop.f32.mrf.mxu1 }
 0x20a   :  { %v2178_v7 = vpop.f32.mrf.mxu1 }
 0x20c   :  { %v954_v10 = vpop.f32.mrf.mxu1 }
 0x20d   :  { %v964_v12 = vsel %vm960_vm2, %v954_v10, -inf }
 0x20e   :  { %965 = vmax.xlane.f32.xlu0 %v964_v12  ;;  %v2183_v13 = vpop.f32.mrf.mxu1 }
 0x210   :  { %v957_v14 = vpop.f32.mrf.mxu1 }
 0x212   :  { %v2184_v15 = vpop.f32.mrf.mxu1 }
 0x224   :  { %1082 = vrot.lane.b32.xlu0 %v2703_v19, %s2637_s2  ;;  %v198_v19 = vrot.slane %v2695_v11, %v197_v30 }
 0x226   :  { %v810_v34 = vadd.f32 %v809_v33, %v198_v19  ;;  %v814_v41 = vadd.f32 %v813_v40, %v198_v19 }
 0x228   :  { %v2740_v35 = vpack.c.bf16 %v810_v34, %v810_v34  ;;  %v865_v43 = vpack.c.bf16 %v814_v41, %v814_v41 }
 0x22a   :  { %v990_v36 = vsel %vm988_vm3, %v2740_v35, 0 }
 0x22b   :  { %2186 = vmatpush3.bf16.msra.mxu1 %v990_v36 }
 0x22c   :  { %2191 = vmatprep.subr.bf16.mxu1 %v2635_v6 }
 0x28f   :  { %v963_v5 = vpop.xlane.xlu0 %962 }
 0x290   :  { %v967_v16 = vsub.f32 %v908_v1, %v963_v5 }
 0x292   :  { %v969_v17 = vmul.f32 1.442695, %v967_v16 }
 0x294   :  { %2485 = vpow2.f32 %v969_v17 }
 0x297   :  { %v966_v20 = vpop.xlane.xlu0 %965 }
 0x298   :  { %v968_v21 = vsub.f32 %v954_v10, %v966_v20 }
 0x29a   :  { %v971_v22 = vmul.f32 1.442695, %v968_v21 }
 0x29b   :  { %v1083_v46 = vpop.permute.xlu0 %1082 }
 0x29c   :  { %2487 = vpow2.f32 %v971_v22  ;;  %v1088_v49 = vsel %vm867_vm1, %v1083_v46, 0  ;;  %v201_v46 = vsub.s32 5, %v2691_v8 }
 0x2a1   :  { %v2486_v24 = vpop.eup %2485 }
 0x2a2   :  { %v973_v27 = vsel %vm960_vm2, %v2486_v24, 0.0 }
 0x2a3   :  { %974 = vadd.xlane.f32.xlu1 %v973_v27 }
 0x2a9   :  { %v2488_v28 = vpop.eup %2487 }
 0x2aa   :  { %v976_v29 = vsel %vm960_vm2, %v2488_v28, 0.0 }
 0x2ab   :  { %977 = vadd.xlane.f32.xlu1 %v976_v29  ;;  %v193_v29 = vsub.s32 3, %v2691_v8 }
 0x2ad   :  { %v194_v34 = vrot.slane %v2695_v11, %v193_v29 }
 0x2af   :  { %v769_v40 = vadd.f32 %v2701_v18, %v194_v34 }
 0x2bc   :  { %1079 = vrot.lane.b32.xlu1 %v2710_v25, %s2637_s2  ;;  %v1036_v25 = vsel %vm988_vm3, %v865_v43, 0 }
 0x2c0   :  { %1134 = vrot.lane.b32.xlu1 %v2712_v26, %s2637_s2 }
 0x2c4   :  { %1131 = vrot.lane.b32.xlu1 %v2721_v31, %s2637_s2 }
 0x32c   :  { %v975_v37 = vpop.xlane.xlu1 %974 }
 0x32d   :  { %2489 = vrcp.f32 %v975_v37 }
 0x334   :  { %v978_v39 = vpop.xlane.xlu1 %977 }
 0x335   :  { %2491 = vrcp.f32 %v978_v39  ;;  %v185_v39 = vsub.s32 1, %v2691_v8 }
 0x338   :  { %v1080_v48 = vpop.permute.xlu1 %1079 }
 0x33a   :  { %v2490_v42 = vpop.eup %2489 }
 0x33b   :  { %v981_v44 = vmul.f32 %v2490_v42, %v2486_v24  ;;  %v186_v42 = vrot.slane %v2695_v11, %v185_v39 }
 0x33c   :  { %v1135_v50 = vpop.permute.xlu1 %1134 }
 0x33d   :  { %v983_v45 = vpack.c.bf16 %v981_v44, %v981_v44  ;;  %v1140_v51 = vsel %vm867_vm1, %v1135_v50, 0  ;;  %v2796_v44 = vpack.c.bf16 %v769_v40, %v769_v40  ;;  %v726_v18 = vadd.f32 %v2707_v23, %v186_v42 }
 0x33e   :  { %v202_v23 = vrot.slane %v2695_v11, %v201_v46  ;;  %v730_v50 = vadd.f32 %v2737_v32, %v186_v42 }
 0x33f   :  { %2188 = vmatmul.mubr.msk.bf16.vlgmr.msra.gmra.mxu1 %vm960_vm2, %v983_v45 }
 0x340   :  { %2192 = vmatpush3.bf16.msra.mxu1 %v1036_v25  ;;  %2193 = vmatprep.mubr.msk.bf16.mxu1 %vm2636_vm0, %v2635_v6  ;;  %v1132_v52 = vpop.permute.xlu1 %1131 }
 0x341   :  { %2197 = vmatprep.subr.bf16.mxu1 %v2635_v6 }
 0x342   :  { %v2492_v26 = vpop.eup %2491 }
 0x343   :  { %v982_v31 = vmul.f32 %v2492_v26, %v2488_v28  ;;  %v1308_v26 = vsel %vm867_vm1, %v2796_v44, 0 }
 0x345   :  { %v984_v47 = vpack.c.bf16 %v982_v31, %v982_v31  ;;  %v773_v31 = vadd.f32 %v2728_v0, %v194_v34  ;;  %v812_v0 = vadd.f32 %v2751_v38, %v202_v23 }
 0x347   :  { %2194 = vmatmul.mubr.msk.bf16.vlgmr.msra.gmra.mxu1 %vm960_vm2, %v984_v47  ;;  %v852_v47 = vmul.f32 0.125, %v726_v18 }
 0x348   :  { %2198 = vmatpush3.bf16.xpose.msra.mxu1 %v1088_v49  ;;  %2199 = vmatprep.mubr.msk.bf16.mxu1 %vm2636_vm0, %v2635_v6 }
 0x349   :  { %2203 = vmatprep.subr.bf16.mxu1 %v2635_v6  ;;  %v856_v49 = vpack.c.bf16 %v852_v47, %v852_v47 }
 0x34f   :  { %2200 = vmatmul.mubr.msk.bf16.vlgmr.msra.gmra.mxu1 %vm867_vm1, %v1080_v48  ;;  %v862_v48 = vpack.c.bf16 %v773_v31, %v773_v31 }
 0x350   :  { %2204 = vmatpush3.bf16.xpose.msra.mxu1 %v1140_v51  ;;  %2205 = vmatprep.mubr.msk.bf16.mxu1 %vm2636_vm0, %v2635_v6 }
 0x351   :  { %2209 = vmatprep.subr.bf16.mxu1 %v2635_v6  ;;  %v1354_v51 = vsel %vm867_vm1, %v862_v48, 0 }
 0x357   :  { %2206 = vmatmul.mubr.msk.bf16.vlgmr.msra.gmra.mxu1 %vm867_vm1, %v1132_v52  ;;  %v854_v52 = vmul.f32 0.125, %v730_v50 }
 0x358   :  { %2211 = vmatprep.mubr.msk.bf16.mxu1 %vm2636_vm0, %v2635_v6 }
 0x3ff   :  { %v2771_v53 = vpop.f32.mrf.mxu1 }
 0x401   :  { %v2189_v54 = vpop.f32.mrf.mxu1 }
 0x402   :  { %v2815_v54 = vpack.c.bf16 %v812_v0, %v812_v0 }
 0x403   :  { %v1029_v55 = vpop.f32.mrf.mxu1 }
 0x404   :  { %v858_v55 = vpack.c.bf16 %v854_v52, %v854_v52  ;;  %v1424_v11 = vsel %vm988_vm3, %v2815_v54, 0 }
 0x405   :  { %v2190_v56 = vpop.f32.mrf.mxu1 }
 0x407   :  { %v2773_v57 = vpop.f32.mrf.mxu1 }
 0x409   :  { %v2195_v58 = vpop.f32.mrf.mxu1 }
 0x40b   :  { %v1075_v59 = vpop.f32.mrf.mxu1 }
 0x40d   :  { %v2196_v60 = vpop.f32.mrf.mxu1 }
 0x40f   :  { %v1124_v61 = vpop.f32.mrf.mxu1 }
 0x410   :  { %v1182_v62 = vsel %vm960_vm2, %v1124_v61, -inf }
 0x411   :  { %1183 = vmax.xlane.f32.xlu0 %v1182_v62  ;;  %v2201_v63 = vpop.f32.mrf.mxu1 }
 0x413   :  { %v1127_v1 = vpop.f32.mrf.mxu1 }
 0x415   :  { %v2202_v2 = vpop.f32.mrf.mxu1 }
 0x417   :  { %v1176_v3 = vpop.f32.mrf.mxu1 }
 0x418   :  { %v1185_v4 = vsel %vm960_vm2, %v1176_v3, -inf }
 0x419   :  { %1186 = vmax.xlane.f32.xlu1 %v1185_v4  ;;  %v2207_v7 = vpop.f32.mrf.mxu1 }
 0x41b   :  { %v1179_v10 = vpop.f32.mrf.mxu1 }
 0x41d   :  { %v2208_v12 = vpop.f32.mrf.mxu1 }
 0x42a   :  { %1256 = vrot.lane.b32.xlu1 %v865_v43, %s2637_s2 }
 0x49a   :  { %v1184_v13 = vpop.xlane.xlu0 %1183 }
 0x49b   :  { %v1188_v14 = vsub.f32 %v1124_v61, %v1184_v13 }
 0x49d   :  { %v1190_v15 = vmul.f32 1.442695, %v1188_v14 }
 0x49f   :  { %2493 = vpow2.f32 %v1190_v15 }
 0x4a2   :  { %v1187_v5 = vpop.xlane.xlu1 %1186 }
 0x4a3   :  { %v1189_v16 = vsub.f32 %v1176_v3, %v1187_v5 }
 0x4a5   :  { %v1192_v17 = vmul.f32 1.442695, %v1189_v16 }
 0x4a6   :  { %v1257_v37 = vpop.permute.xlu1 %1256 }
 0x4a7   :  { %2495 = vpow2.f32 %v1192_v17  ;;  %v1262_v41 = vsel %vm988_vm3, %v1257_v37, 0 }
 0x4ac   :  { %v2494_v20 = vpop.eup %2493 }
 0x4ad   :  { %v1194_v21 = vsel %vm960_vm2, %v2494_v20, 0.0 }
 0x4ae   :  { %1195 = vadd.xlane.f32.xlu0 %v1194_v21 }
 0x4b4   :  { %v2496_v22 = vpop.eup %2495 }
 0x4b5   :  { %v1197_v24 = vsel %vm960_vm2, %v2496_v22, 0.0 }
 0x4b6   :  { %1198 = vadd.xlane.f32.xlu0 %v1197_v24 }
 0x4cc   :  { %1207 = vrot.lane.b32.xlu0 %v2740_v35, %s2637_s2 }
 0x537   :  { %v1196_v27 = vpop.xlane.xlu0 %1195 }
 0x538   :  { %2497 = vrcp.f32 %v1196_v27 }
 0x53f   :  { %v1199_v28 = vpop.xlane.xlu0 %1198 }
 0x540   :  { %2499 = vrcp.f32 %v1199_v28 }
 0x543   :  { %v1208_v30 = vpop.permute.xlu0 %1207 }
 0x544   :  { %v1213_v19 = vsel %vm988_vm3, %v1208_v30, 0 }
 0x545   :  { %v2498_v33 = vpop.eup %2497  ;;  %2210 = vmatpush3.bf16.msra.mxu1 %v1213_v19  ;;  %v815_v19 = vpop.f32.mrf.mxu0 }
 0x546   :  { %2215 = vmatprep.subr.bf16.mxu1 %v2635_v6  ;;  %v1202_v36 = vmul.f32 %v2498_v33, %v2494_v20  ;;  %v816_v34 = vadd.f32 %v815_v19, %v202_v23 }
 0x548   :  { %v1204_v35 = vpack.c.bf16 %v1202_v36, %v1202_v36  ;;  %v866_v37 = vpack.c.bf16 %v816_v34, %v816_v34  ;;  %v2437_v34 = vld [vmem:[#allocation8 + $0x70] ss:$8 sps:$4 sm:$0xff]  }
 0x54a   :  { %2212 = vmatmul.mubr.msk.bf16.vlgmr.msra.gmra.mxu1 %vm960_vm2, %v1204_v35 }
 0x54b   :  { %2216 = vmatpush3.bf16.msra.mxu1 %v1262_v41  ;;  %2217 = vmatprep.mubr.msk.bf16.mxu1 %vm2636_vm0, %v2635_v6  ;;  %v1470_v41 = vsel %vm988_vm3, %v866_v37, 0 }
 0x54c   :  { %2221 = vmatprep.subr.bf16.mxu1 %v2635_v6 }
 0x54d   :  { %v2500_v43 = vpop.eup %2499 }
 0x54e   :  { %v1203_v45 = vmul.f32 %v2500_v43, %v2496_v22 }
 0x550   :  { %v1205_v25 = vpack.c.bf16 %v1203_v45, %v1203_v45 }
 0x552   :  { %2218 = vmatmul.mubr.msk.bf16.vlgmr.msra.gmra.mxu1 %vm960_vm2, %v1205_v25 }
 0x553   :  { %2222 = vmatpush3.bf16.xpose.msra.mxu1 %v1308_v26  ;;  %2223 = vmatprep.mubr.msk.bf16.mxu1 %vm2636_vm0, %v2635_v6 }
 0x554   :  { %2227 = vmatprep.subr.bf16.mxu1 %v2635_v6 }
 0x55a   :  { %2224 = vmatmul.mubr.msk.bf16.vlgmr.msra.gmra.mxu1 %vm867_vm1, %v856_v49 }
 0x55b   :  { %2228 = vmatpush3.bf16.xpose.msra.mxu1 %v1354_v51  ;;  %2229 = vmatprep.mubr.msk.bf16.mxu1 %vm2636_vm0, %v2635_v6 }
 0x55c   :  { %2233 = vmatprep.subr.bf16.mxu1 %v2635_v6 }
 0x562   :  { %2230 = vmatmul.mubr.msk.bf16.vlgmr.msra.gmra.mxu1 %vm867_vm1, %v858_v55 }
 0x563   :  { %2234 = vmatpush3.bf16.msra.mxu1 %v1424_v11  ;;  %2235 = vmatprep.mubr.msk.bf16.mxu1 %vm2636_vm0, %v2635_v6 }
 0x564   :  { %2239 = vmatprep.subr.bf16.mxu1 %v2635_v6 }
 0x60a   :  { %v2823_v32 = vpop.f32.mrf.mxu1 }
 0x60c   :  { %v2213_v38 = vpop.f32.mrf.mxu1 }
 0x60e   :  { %v1252_v56 = vpop.f32.mrf.mxu1 }
 0x610   :  { %v2214_v58 = vpop.f32.mrf.mxu1 }
 0x612   :  { %v2825_v59 = vpop.f32.mrf.mxu1 }
 0x613   :  { %v2288_v60 = vpack.i.bf16 %v2825_v59, %v2823_v32 }
 0x614   :  { %v2219_v61 = vpop.f32.mrf.mxu1 }
 0x616   :  { %v1301_v62 = vpop.f32.mrf.mxu1 }
 0x618   :  { %v2220_v63 = vpop.f32.mrf.mxu1 }
 0x61a   :  { %v1344_v1 = vpop.f32.mrf.mxu1 }
 0x61b   :  { %v1396_v2 = vsel %vm960_vm2, %v1344_v1, -inf }
 0x61c   :  { %1397 = vmax.xlane.f32.xlu1 %v1396_v2  ;;  %v2225_v3 = vpop.f32.mrf.mxu1 }
 0x61e   :  { %v1347_v4 = vpop.f32.mrf.mxu1 }
 0x620   :  { %v2226_v7 = vpop.f32.mrf.mxu1 }
 0x622   :  { %v1390_v10 = vpop.f32.mrf.mxu1 }
 0x623   :  { %v1399_v12 = vsel %vm960_vm2, %v1390_v10, -inf }
 0x624   :  { %1400 = vmax.xlane.f32.xlu0 %v1399_v12  ;;  %v2231_v13 = vpop.f32.mrf.mxu1 }
 0x626   :  { %v1393_v14 = vpop.f32.mrf.mxu1 }
 0x628   :  { %v2232_v15 = vpop.f32.mrf.mxu1 }
 0x6a5   :  { %v1398_v5 = vpop.xlane.xlu1 %1397 }
 0x6a6   :  { %v1402_v16 = vsub.f32 %v1344_v1, %v1398_v5 }
 0x6a8   :  { %v1404_v17 = vmul.f32 1.442695, %v1402_v16 }
 0x6aa   :  { %2501 = vpow2.f32 %v1404_v17 }
 0x6ad   :  { %v1401_v20 = vpop.xlane.xlu0 %1400 }
 0x6ae   :  { %v1403_v21 = vsub.f32 %v1390_v10, %v1401_v20 }
 0x6b0   :  { %v1406_v22 = vmul.f32 1.442695, %v1403_v21 }
 0x6b2   :  { %2503 = vpow2.f32 %v1406_v22 }
 0x6b7   :  { %v2502_v24 = vpop.eup %2501 }
 0x6b8   :  { %v1408_v27 = vsel %vm960_vm2, %v2502_v24, 0.0 }
 0x6b9   :  { %1409 = vadd.xlane.f32.xlu0 %v1408_v27 }
 0x6bf   :  { %v2504_v28 = vpop.eup %2503 }
 0x6c0   :  { %v1411_v29 = vsel %vm960_vm2, %v2504_v28, 0.0 }
 0x6c1   :  { %1412 = vadd.xlane.f32.xlu1 %v1411_v29 }
 0x6cf   :  { %1516 = vrot.lane.b32.xlu0 %v2796_v44, %s2637_s2 }
 0x6d2   :  { %1513 = vrot.lane.b32.xlu1 %v856_v49, %s2637_s2 }
 0x6d6   :  { %1568 = vrot.lane.b32.xlu1 %v862_v48, %s2637_s2 }
 0x6da   :  { %1565 = vrot.lane.b32.xlu1 %v858_v55, %s2637_s2 }
 0x742   :  { %v1410_v30 = vpop.xlane.xlu0 %1409 }
 0x743   :  { %2505 = vrcp.f32 %v1410_v30 }
 0x746   :  { %v1517_v44 = vpop.permute.xlu0 %1516 }
 0x747   :  { %v1522_v25 = vsel %vm867_vm1, %v1517_v44, 0  ;;  %v2449_v44 = vld [vmem:[#allocation8 + $0x30] ss:$8 sps:$4 sm:$0xff]  }
 0x74a   :  { %v1413_v33 = vpop.xlane.xlu1 %1412 }
 0x74b   :  { %2507 = vrcp.f32 %v1413_v33 }
 0x74e   :  { %v1514_v18 = vpop.permute.xlu1 %1513 }
 0x750   :  { %v2506_v36 = vpop.eup %2505 }
 0x751   :  { %v1416_v35 = vmul.f32 %v2506_v36, %v2502_v24  ;;  %v2439_v36 = vld [vmem:[#allocation8 + $0x74] ss:$8 sps:$4 sm:$0xff]  }
 0x752   :  { %v1569_v26 = vpop.permute.xlu1 %1568  ;;  %1931 = vmatprep.subr.bf16.mxu0 %v2439_v36 }
 0x753   :  { %v1418_v40 = vpack.c.bf16 %v1416_v35, %v1416_v35  ;;  %v1574_v31 = vsel %vm867_vm1, %v1569_v26, 0  ;;  %1932 = vmatpush1.bf16.msra.mxu0 %v2437_v34  ;;  %v2440_v35 = vld [vmem:[#allocation8 + $0x60] ss:$8 sps:$4 sm:$0xff]   ;;  %v2455_v26 = vld [vmem:[#allocation8 + $0x10] ss:$8 sps:$4 sm:$0xff]  }
 0x755   :  { %2236 = vmatmul.mubr.msk.bf16.vlgmr.msra.gmra.mxu1 %vm960_vm2, %v1418_v40  ;;  %v2445_v40 = vld [vmem:[#allocation8 + $0x54] ss:$8 sps:$4 sm:$0xff]  }
 0x756   :  { %2240 = vmatpush3.bf16.msra.mxu1 %v1470_v41  ;;  %2241 = vmatprep.mubr.msk.bf16.mxu1 %vm2636_vm0, %v2635_v6  ;;  %v1566_v46 = vpop.permute.xlu1 %1565  ;;  %v2443_v41 = vld [vmem:[#allocation8 + $0x50] ss:$8 sps:$4 sm:$0xff]  }
 0x757   :  { %2245 = vmatprep.subr.bf16.mxu1 %v2635_v6 }
 0x758   :  { %v2508_v42 = vpop.eup %2507 }
 0x759   :  { %v1417_v43 = vmul.f32 %v2508_v42, %v2504_v28  ;;  %v2448_v42 = vld [vmem:[#allocation8 + $0x44] ss:$8 sps:$4 sm:$0xff]  }
 0x75b   :  { %v1419_v45 = vpack.c.bf16 %v1417_v43, %v1417_v43  ;;  %v2446_v43 = vld [vmem:[#allocation8 + $0x40] ss:$8 sps:$4 sm:$0xff]  }
 0x75d   :  { %2242 = vmatmul.mubr.msk.bf16.vlgmr.msra.gmra.mxu1 %vm960_vm2, %v1419_v45  ;;  %v2454_v45 = vld [vmem:[#allocation8 + $0x24] ss:$8 sps:$4 sm:$0xff]  }
 0x75e   :  { %2246 = vmatpush3.bf16.xpose.msra.mxu1 %v1522_v25  ;;  %2247 = vmatprep.mubr.msk.bf16.mxu1 %vm2636_vm0, %v2635_v6  ;;  %v2457_v25 = vld [vmem:[#allocation8 + $0x14] ss:$8 sps:$4 sm:$0xff]  }
 0x75f   :  { %2251 = vmatprep.subr.bf16.mxu1 %v2635_v6 }
 0x765   :  { %2248 = vmatmul.mubr.msk.bf16.vlgmr.msra.gmra.mxu1 %vm867_vm1, %v1514_v18  ;;  %v2452_v18 = vld [vmem:[#allocation8 + $0x20] ss:$8 sps:$4 sm:$0xff]  }
 0x766   :  { %2252 = vmatpush3.bf16.xpose.msra.mxu1 %v1574_v31  ;;  %2253 = vmatprep.mubr.msk.bf16.mxu1 %vm2636_vm0, %v2635_v6  ;;  %v2460_v31 = vld [vmem:[#allocation8 + $0x4] ss:$8 sps:$4 sm:$0xff]  }
 0x767   :  { %2257 = vmatprep.subr.bf16.mxu1 %v2635_v6 }
 0x76d   :  { %2254 = vmatmul.mubr.msk.bf16.vlgmr.msra.gmra.mxu1 %vm867_vm1, %v1566_v46  ;;  %v2458_v46 = vld [vmem:[#allocation8] ss:$8 sps:$4 sm:$0xff]  }
 0x76e   :  { %2259 = vmatprep.mubr.msk.bf16.mxu1 %vm2636_vm0, %v2635_v6 }
 0x815   :  { %v2856_v47 = vpop.f32.mrf.mxu1 }
 0x817   :  { %v2237_v48 = vpop.f32.mrf.mxu1 }
 0x818   :  { %v2463_v48 = vld [vmem:[#allocation8 + $0xf4] ss:$8 sps:$4 sm:$0xff]  }
 0x819   :  { %v1463_v23 = vpop.f32.mrf.mxu1 }
 0x81a   :  { %v2461_v23 = vld [vmem:[#allocation8 + $0xf0] ss:$8 sps:$4 sm:$0xff]  }
 0x81b   :  { %v2238_v49 = vpop.f32.mrf.mxu1 }
 0x81c   :  { %v2466_v49 = vld [vmem:[#allocation8 + $0xe4] ss:$8 sps:$4 sm:$0xff]  }
 0x81d   :  { %v2858_v50 = vpop.f32.mrf.mxu1 }
 0x81f   :  { %v2243_v51 = vpop.f32.mrf.mxu1 }
 0x820   :  { %v2464_v51 = vld [vmem:[#allocation8 + $0xe0] ss:$8 sps:$4 sm:$0xff]  }
 0x821   :  { %v1509_v0 = vpop.f32.mrf.mxu1 }
 0x822   :  { %v2469_v0 = vld [vmem:[#allocation8 + $0xd4] ss:$8 sps:$4 sm:$0xff]  }
 0x823   :  { %v2244_v52 = vpop.f32.mrf.mxu1 }
 0x824   :  { %v2467_v52 = vld [vmem:[#allocation8 + $0xd0] ss:$8 sps:$4 sm:$0xff]  }
 0x825   :  { %v1558_v55 = vpop.f32.mrf.mxu1 }
 0x826   :  { %v1616_v11 = vsel %vm960_vm2, %v1558_v55, -inf }
 0x827   :  { %1617 = vmax.xlane.f32.xlu0 %v1616_v11  ;;  %v2249_v38 = vpop.f32.mrf.mxu1  ;;  %v2470_v11 = vld [vmem:[#allocation8 + $0xc0] ss:$8 sps:$4 sm:$0xff]  }
 0x828   :  { %v2475_v38 = vld [vmem:[#allocation8 + $0xb4] ss:$8 sps:$4 sm:$0xff]  }
 0x829   :  { %v1561_v56 = vpop.f32.mrf.mxu1 }
 0x82a   :  { %v2473_v56 = vld [vmem:[#allocation8 + $0xb0] ss:$8 sps:$4 sm:$0xff]  }
 0x82b   :  { %v2250_v58 = vpop.f32.mrf.mxu1 }
 0x82c   :  { %v2478_v58 = vld [vmem:[#allocation8 + $0xa4] ss:$8 sps:$4 sm:$0xff]  }
 0x82d   :  { %v1610_v61 = vpop.f32.mrf.mxu1 }
 0x82e   :  { %v1619_v62 = vsel %vm960_vm2, %v1610_v61, -inf }
 0x82f   :  { %1620 = vmax.xlane.f32.xlu1 %v1619_v62  ;;  %v2255_v63 = vpop.f32.mrf.mxu1  ;;  %v2479_v62 = vld [vmem:[#allocation8 + $0x90] ss:$8 sps:$4 sm:$0xff]  }
 0x830   :  { %v2481_v63 = vld [vmem:[#allocation8 + $0x94] ss:$8 sps:$4 sm:$0xff]  }
 0x831   :  { %v1613_v1 = vpop.f32.mrf.mxu1 }
 0x833   :  { %v2256_v2 = vpop.f32.mrf.mxu1 }
 0x840   :  { %1690 = vrot.lane.b32.xlu1 %v866_v37, %s2637_s2  ;;  %v2442_v37 = vld [vmem:[#allocation8 + $0x64] ss:$8 sps:$4 sm:$0xff]  }
 0x841   :  { %1933 = vmatprep.subr.bf16.mxu0 %v2442_v37 }
 0x842   :  { %1934 = vmatpush1.bf16.msra.mxu0 %v2440_v35 }
 0x843   :  { %1935 = vmatprep.subr.bf16.mxu0 %v2445_v40 }
 0x846   :  { %1936 = vmatpush1.bf16.msra.mxu0 %v2443_v41 }
 0x847   :  { %1937 = vmatprep.subr.bf16.mxu0 %v2448_v42 }
 0x84a   :  { %1938 = vmatpush1.bf16.msra.mxu0 %v2446_v43 }
 0x8b0   :  { %v1618_v3 = vpop.xlane.xlu0 %1617 }
 0x8b1   :  { %v1622_v4 = vsub.f32 %v1558_v55, %v1618_v3  ;;  %v2472_v55 = vld [vmem:[#allocation8 + $0xc4] ss:$8 sps:$4 sm:$0xff]  }
 0x8b2   :  { %v2484_v3 = vld [vmem:[#allocation8 + $0x84] ss:$8 sps:$4 sm:$0xff]  }
 0x8b3   :  { %v1624_v7 = vmul.f32 1.442695, %v1622_v4  ;;  %v2482_v4 = vld [vmem:[#allocation8 + $0x80] ss:$8 sps:$4 sm:$0xff]  }
 0x8b5   :  { %2509 = vpow2.f32 %v1624_v7 }
 0x8b8   :  { %v1621_v10 = vpop.xlane.xlu1 %1620 }
 0x8b9   :  { %v1623_v12 = vsub.f32 %v1610_v61, %v1621_v10  ;;  %v2476_v61 = vld [vmem:[#allocation8 + $0xa0] ss:$8 sps:$4 sm:$0xff]  }
 0x8bb   :  { %v1626_v13 = vmul.f32 1.442695, %v1623_v12 }
 0x8bc   :  { %v1691_v28 = vpop.permute.xlu1 %1690 }
 0x8bd   :  { %2511 = vpow2.f32 %v1626_v13  ;;  %v1696_v30 = vsel %vm988_vm3, %v1691_v28, 0 }
 0x8c2   :  { %v2510_v14 = vpop.eup %2509 }
 0x8c3   :  { %v1628_v15 = vsel %vm960_vm2, %v2510_v14, 0.0 }
 0x8c4   :  { %1629 = vadd.xlane.f32.xlu0 %v1628_v15 }
 0x8ca   :  { %v2512_v5 = vpop.eup %2511 }
 0x8cb   :  { %v1631_v16 = vsel %vm960_vm2, %v2512_v5, 0.0 }
 0x8cc   :  { %1632 = vadd.xlane.f32.xlu0 %v1631_v16 }
 0x8e2   :  { %1641 = vrot.lane.b32.xlu0 %v2815_v54, %s2637_s2 }
 0x94d   :  { %v1630_v17 = vpop.xlane.xlu0 %1629 }
 0x94e   :  { %2513 = vrcp.f32 %v1630_v17 }
 0x955   :  { %v1633_v20 = vpop.xlane.xlu0 %1632 }
 0x956   :  { %2515 = vrcp.f32 %v1633_v20 }
 0x959   :  { %v1642_v21 = vpop.permute.xlu0 %1641 }
 0x95a   :  { %v1647_v22 = vsel %vm988_vm3, %v1642_v21, 0 }
 0x95b   :  { %v2514_v24 = vpop.eup %2513  ;;  %2258 = vmatpush3.bf16.msra.mxu1 %v1647_v22 }
 0x95c   :  { %2263 = vmatprep.subr.bf16.mxu1 %v2635_v6  ;;  %v1636_v27 = vmul.f32 %v2514_v24, %v2510_v14 }
 0x95e   :  { %v1638_v29 = vpack.c.bf16 %v1636_v27, %v1636_v27 }
 0x960   :  { %2260 = vmatmul.mubr.msk.bf16.vlgmr.msra.gmra.mxu1 %vm960_vm2, %v1638_v29 }
 0x961   :  { %2264 = vmatpush3.bf16.msra.mxu1 %v1696_v30  ;;  %2265 = vmatprep.mubr.msk.bf16.mxu1 %vm2636_vm0, %v2635_v6  ;;  %v2451_v6 = vld [vmem:[#allocation8 + $0x34] ss:$8 sps:$4 sm:$0xff]  }
 0x962   :  { %1939 = vmatprep.subr.bf16.mxu0 %v2451_v6 }
 0x963   :  { %v2516_v54 = vpop.eup %2515  ;;  %1940 = vmatpush1.bf16.msra.mxu0 %v2449_v44 }
 0x964   :  { %v1637_v19 = vmul.f32 %v2516_v54, %v2512_v5  ;;  %1941 = vmatprep.subr.bf16.mxu0 %v2454_v45 }
 0x966   :  { %v1639_v33 = vpack.c.bf16 %v1637_v19, %v1637_v19 }
 0x967   :  { %1942 = vmatpush1.bf16.msra.mxu0 %v2452_v18 }
 0x968   :  { %2266 = vmatmul.mubr.msk.bf16.vlgmr.msra.gmra.mxu1 %vm960_vm2, %v1639_v33  ;;  %1943 = vmatprep.subr.bf16.mxu0 %v2457_v25 }
 0x96b   :  { %1944 = vmatpush1.bf16.msra.mxu0 %v2455_v26 }
 0x96c   :  { %1945 = vmatprep.subr.bf16.mxu0 %v2460_v31 }
 0x96f   :  { %1946 = vmatpush1.bf16.msra.mxu0 %v2458_v46 }
 0x970   :  { %1947 = vmatprep.subr.bf16.mxu0 %v2463_v48 }
 0x973   :  { %1948 = vmatpush2.bf16.msra.mxu0 %v2461_v23 }
 0x974   :  { %1949 = vmatprep.subr.bf16.mxu0 %v2466_v49 }
 0x977   :  { %1950 = vmatpush2.bf16.msra.mxu0 %v2464_v51 }
 0x978   :  { %1951 = vmatprep.subr.bf16.mxu0 %v2469_v0 }
 0x97b   :  { %1952 = vmatpush2.bf16.msra.mxu0 %v2467_v52 }
 0x97c   :  { %1953 = vmatprep.subr.bf16.mxu0 %v2472_v55 }
 0x97f   :  { %1954 = vmatpush2.bf16.msra.mxu0 %v2470_v11 }
 0x980   :  { %1955 = vmatprep.subr.bf16.mxu0 %v2475_v38 }
 0x983   :  { %1956 = vmatpush2.bf16.msra.mxu0 %v2473_v56 }
 0x984   :  { %1957 = vmatprep.subr.bf16.mxu0 %v2478_v58 }
 0x987   :  { %1958 = vmatpush2.bf16.msra.mxu0 %v2476_v61 }
 0x988   :  { %1959 = vmatprep.subr.bf16.mxu0 %v2481_v63 }
 0x98b   :  { %1960 = vmatpush2.bf16.msra.mxu0 %v2479_v62 }
 0x98c   :  { %1961 = vmatprep.subr.bf16.mxu0 %v2484_v3 }
 0x98f   :  { %1962 = vmatpush2.bf16.msra.mxu0 %v2482_v4 }
 0xa20   :  { %v1683_v1 = vpop.f32.mrf.mxu1 }
 0xa22   :  { %v2261_v2 = vpop.f32.mrf.mxu1 }
 0xa24   :  { %v1686_v7 = vpop.f32.mrf.mxu1 }
 0xa26   :  { %v2262_v10 = vpop.f32.mrf.mxu1 }
 0xa28   :  { %v1732_v12 = vpop.f32.mrf.mxu1 }
 0xa29   :  { %v2283_v13 = vpack.i.bf16 %v1732_v12, %v1683_v1 }
 0xa2a   :  { %v2267_v14 = vpop.f32.mrf.mxu1 }
 0xa2b   :  { %2284 = vrot.lane.b32.xlu1 %v2283_v13, %s2637_s2 }
 0xa2c   :  { %v1735_v15 = vpop.f32.mrf.mxu1 }
 0xa2e   :  { %v2268_v5 = vpop.f32.mrf.mxu1 }
 0xa2f   :  { %2289 = vrot.lane.b32.xlu1 %v2288_v60, %s2637_s2  ;;  %v850_v60 = vld [vmem:[%s2904_s4] sm:$0x3]  ;;  %s2597_s4 = scalar_lea.vmem %s1984_s19, 512 }
 0xa30   :  { %p2598_p6 = scmp.ne.s32.totalorder %s1984_s19, %s2597_s4  ;;  %p2603_p8 = scmp.lt.s32.totalorder %s2597_s4, %s2597_s4 }
 0xa32   :  { %p2604_p9 = por %p2603_p8, %p2602_p7 }
 0xa34   :  { %p2605_p10 = pnand %p2604_p9, %p2598_p6 }
 0xa9d   :  { %v2285_v16 = vpop.permute.xlu1 %2284 }
 0xa9e   :  { %v2287_v17 = vunpack.i.h.bf16 %v2285_v16  ;;  %v2286_v20 = vunpack.i.l.bf16 %v2285_v16 }
 0xaa0   :  { %v1756_v21 = vsel %vm867_vm1, %v2856_v47, %v2286_v20  ;;  %v1757_v22 = vsel %vm867_vm1, %v2858_v50, %v2287_v17  ;;  %v1764_v47 = vrot.slane %v850_v60, %v181_v9  ;;  %v1768_v50 = vrot.slane %v850_v60, %v185_v39 }
 0xaa1   :  { %v2290_v24 = vpop.permute.xlu1 %2289  ;;  %v1759_v27 = vpack.c.bf16 %v1757_v22, %v1756_v21 }
 0xaa2   :  { %v2292_v28 = vunpack.i.h.bf16 %v2290_v24  ;;  %v2291_v29 = vunpack.i.l.bf16 %v2290_v24 }
 0xaa3   :  { %1963 = vmatprep.mubr.bf16.mxu0 %v1759_v27 }
 0xaa4   :  { %v1755_v30 = vsel %vm867_vm1, %v2773_v57, %v2292_v28  ;;  %v1754_v32 = vsel %vm867_vm1, %v2771_v53, %v2291_v29 }
 0xaa5   :  { %v1758_v59 = vpack.c.bf16 %v1755_v30, %v1754_v32 }
 0xaa7   :  { %1964 = vmatmul.mubr.bf16.vlgmr.msra.gmra.mxu0 %v1758_v59 }
 0xb67   :  { %v1965_v54 = vpop.f32.mrf.mxu0 }
 0xb68   :  { %v1966_v19 = vadd.f32 %v1965_v54, %v1764_v47 }
 0xb69   :  { %v1967_v33 = vpop.f32.mrf.mxu0 }
 0xb6a   :  { %1974 = vst [vmem:[#allocation10] sm:$0xff] %v1966_v19  ;;  %v1968_v57 = vadd.f32 %v1967_v33, %v1768_v50 }
 0xb6b   :  { %v1969_v34 = vpop.f32.mrf.mxu0 }
 0xb6c   :  { %1975 = vst [vmem:[#allocation10 + $0x8] sm:$0xff] %v1968_v57  ;;  %v1970_v53 = vadd.f32 %v1969_v34, %v1764_v47 }
 0xb6d   :  { %v1971_v36 = vpop.f32.mrf.mxu0 }
 0xb6e   :  { %1976 = vst [vmem:[#allocation10 + $0x10] sm:$0xff] %v1970_v53  ;;  %v1972_v37 = vadd.f32 %v1971_v36, %v1768_v50 }
 0xb70   :  { %1977 = vst [vmem:[#allocation10 + $0x18] sm:$0xff] %v1972_v37 }
 0xb71   :  { %2608 = shalt.err (!%p2605_p10)
}
 0xb72   :  { %1989 = dma.vmem_to_hbm [thread:$0]  %s1984_s19, 512, %s2905_s5, [#allocation4], %s2629_s28, %s2629_s28, %s2630_s29  }
 0xb73   :  { %2623 = dma.done.wait [#allocation4], 512  }
 0xb74   :  { %2624 = vsyncadd [#allocation4], 4294966784 }
 0xb75   :  { %1993 = vsyncpa [#allocation3], 1 }
 0xb76   :  { %1994 = vsyncpa [#allocation6], 1 }
 0xb77   :  { %1995 = vsyncpa [#allocation9], 1 }
 0xb78   :  { %1996 = vsyncpa [#allocation4], 1 }

</bundles_post_ra>
